<compile_context>
chip_gen: v6e
topology: v6e:2x2x1
jax: 0.10.0
libtpu: 0.0.40
codegen_flags: <defaults>
</compile_context>

<pallas_src>
import functools

import numpy as np
import jax
import jax.numpy as jnp
from jax.experimental import pallas as pl
from jax.experimental.pallas import tpu as pltpu


def _round_up(x, m):
    return -(-x // m) * m


# ----------------------------------------------------------------------------
# Offsets (identical logic to NghSampler2.precompute_offsets)
# ----------------------------------------------------------------------------
def precompute_offsets(ngh, sub_d, pos_d, neg_d):
    pos_d2 = pos_d ** 2
    neg_d2 = neg_d ** 2
    rad2 = ngh ** 2
    rad = ngh // sub_d * ngh
    pos, neg = [], []
    for j in range(-rad, rad + 1, sub_d):
        for i in range(-rad, rad + 1, sub_d):
            d2 = i * i + j * j
            if d2 <= pos_d2:
                pos.append((i, j))
            elif neg_d2 <= d2 <= rad2:
                neg.append((i, j))
    pos = np.asarray(pos, dtype=np.int32).reshape(-1, 2).T   # (2, P)  row0=x row1=y
    neg = np.asarray(neg, dtype=np.int32).reshape(-1, 2).T   # (2, Nn)
    return pos, neg


@functools.lru_cache(maxsize=None)
def _segment_matrix(D, P, Nn, KDp, Ko):
    """Constant 0/1 matrix mapping flattened-offset lanes to output columns.

    Flat lane j = k*D + d (offset k, feature d).  Offset k is summed into:
      positive offset p (k <  P)  -> column 1 + Nn + p   (scratch tail)
      negative offset m (k >= P)  -> column 1 + m        (final position)
    Column 0 is reserved for the max-pooled positive score.
    """
    K = P + Nn
    seg = np.zeros((KDp, Ko), np.float32)
    for k in range(K):
        col = (1 + Nn + k) if k < P else (1 + (k - P))
        seg[k * D:(k + 1) * D, col] = 1.0
    return seg


# ----------------------------------------------------------------------------
# VMEM budgeting / tile selection
# ----------------------------------------------------------------------------
def _tile_vmem_bytes(tn, D, KDp, Ko, with_pos):
    """Conservative per-tile VMEM estimate (double-buffered blocks + temps)."""
    f32, bf16 = 4, 2
    blocks = (tn * D * f32        # f1 block
              + tn * KDp * f32    # flattened feat2-gather block
              + KDp * Ko * bf16   # segment matrix (constant)
              + tn * Ko * f32)    # scores output block
    if with_pos:
        blocks += tn * f32        # argmax output block
    # f1t, prod, r1, r2 (f32) + hi/mid/lo (bf16) + a few (tn, Ko) temporaries
    inter = tn * KDp * (4 * f32 + 3 * bf16) + 4 * tn * Ko * f32
    return 2 * blocks + inter


def _choose_tile(N, D, KDp, Ko, with_pos, tn_req, budget=40 << 20):
    # Big tiles amortize per-step overhead; keep >=2 grid steps when possible
    # so the "parallel" grid axis can use both v7x TensorCores, then shrink
    # until the conservative VMEM estimate fits the budget.
    tn = max(8, min(_round_up(tn_req, 8), _round_up(-(-N // 2), 8)))
    while tn > 8 and _tile_vmem_bytes(tn, D, KDp, Ko, with_pos) > budget:
        tn = max(8, _round_up(tn // 2, 8))
    return tn


# ----------------------------------------------------------------------------
# Pallas kernel: per query-tile score computation (the hot path)
# ----------------------------------------------------------------------------
def _scores_kernel(f1_ref, f2_ref, seg_ref, sc_ref, *pos_out, K, Nn, P):
    TN, D = f1_ref.shape
    KDp = f2_ref.shape[1]

    f1 = f1_ref[...].astype(jnp.float32)            # (TN, D)
    f2 = f2_ref[...].astype(jnp.float32)            # (TN, KDp) flattened gather

    # Replicate f1 across every offset segment (lane concatenation, VPU work
    # that hides under the f2 DMA).
    pieces = [f1] * K
    if KDp > K * D:
        pieces.append(jnp.zeros((TN, KDp - K * D), jnp.float32))
    f1t = jnp.concatenate(pieces, axis=1)           # (TN, KDp)

    prod = f2 * f1t                                 # (TN, KDp) f32

    # Segment sum on the MXU: every per-offset D-reduction lands directly in
    # its final output column.  Exact-ish f32 via a 3-pass bf16 hi/mid/lo
    # split: the 0/1 segment matrix is exactly representable in bf16, so the
    # only residual is <= 2^-24 relative (f32-rounding level), at half the MXU
    # cost of precision=HIGHEST (6 passes).
    seg = seg_ref[...]                              # (KDp, Ko) bf16, 0/1
    hi = prod.astype(jnp.bfloat16)
    r1 = prod - hi.astype(jnp.float32)
    mid = r1.astype(jnp.bfloat16)
    lo = (r1 - mid.astype(jnp.float32)).astype(jnp.bfloat16)
    s = jnp.dot(hi, seg, preferred_element_type=jnp.float32)
    s = s + jnp.dot(mid, seg, preferred_element_type=jnp.float32)
    s = s + jnp.dot(lo, seg, preferred_element_type=jnp.float32)   # (TN, Ko)

    col = jax.lax.broadcasted_iota(jnp.int32, s.shape, 1)
    pos_lo = 1 + Nn
    is_pos = (col >= pos_lo) & (col < pos_lo + P)
    ps = jnp.where(is_pos, s, -jnp.inf)
    pmax = jnp.max(ps, axis=1, keepdims=True)       # (TN, 1) max-pool over pos

    # column 0 <- pmax; columns [1, 1+Nn) already hold nscores -> single
    # unmasked lane-dense store of the whole slab.
    sc_ref[...] = jnp.where(col == 0, pmax, s)

    if pos_out:                                     # static: only when confs given
        (pos_ref,) = pos_out
        hit = is_pos & (ps == pmax)
        rel = jnp.where(hit, col - pos_lo, jnp.int32(P))
        idx = jnp.min(rel, axis=1, keepdims=True)   # first argmax; P if NaN
        pos_ref[...] = jnp.minimum(idx, P - 1)      # clamp guards the NaN sentinel


def ngh_scores_pallas(f1, f2g, *, P, Nn, with_pos, tn=512):
    """f1: (N, D) query features; f2g: (N, K, D) feat2 gathered at [pos | neg].

    Returns (scores (N, 1+Nn) = [max-pooled pscore | nscores],
             pos (N, 1) int32 argmax over positive offsets, or None).
    """
    N, D = f1.shape
    _, K, D2 = f2g.shape
    assert D2 == D and K == P + Nn
    KDp = _round_up(K * D, 128)
    Ko = _round_up(1 + Nn + P, 128)

    tn = _choose_tile(N, D, KDp, Ko, with_pos, tn)
    n_pad = _round_up(N, tn)

    f2flat = f2g.reshape(N, K * D)
    if KDp != K * D:
        f2flat = jnp.pad(f2flat, ((0, 0), (0, KDp - K * D)))
    if n_pad != N:
        f1 = jnp.pad(f1, ((0, n_pad - N), (0, 0)))
        f2flat = jnp.pad(f2flat, ((0, n_pad - N), (0, 0)))

    seg_m = jnp.asarray(_segment_matrix(int(D), int(P), int(Nn), int(KDp), int(Ko)),
                        dtype=jnp.bfloat16)

    kernel = functools.partial(_scores_kernel, K=K, Nn=Nn, P=P)
    out_shape = [jax.ShapeDtypeStruct((n_pad, Ko), jnp.float32)]
    out_specs = [pl.BlockSpec((tn, Ko), lambda i: (i, 0))]
    if with_pos:
        out_shape.append(jax.ShapeDtypeStruct((n_pad, 1), jnp.int32))
        out_specs.append(pl.BlockSpec((tn, 1), lambda i: (i, 0)))

    vmem_need = _tile_vmem_bytes(tn, D, KDp, Ko, with_pos)
    vmem_limit = int(min(max(vmem_need + (8 << 20), 32 << 20), 64 << 20))

    outs = pl.pallas_call(
        kernel,
        out_shape=tuple(out_shape),
        grid=(n_pad // tn,),
        in_specs=[
            pl.BlockSpec((tn, D), lambda i: (i, 0)),      # f1 (query features)
            pl.BlockSpec((tn, KDp), lambda i: (i, 0)),    # flattened feat2 gather
            pl.BlockSpec((KDp, Ko), lambda i: (0, 0)),    # constant segment matrix
        ],
        out_specs=tuple(out_specs),
        compiler_params=pltpu.CompilerParams(
            dimension_semantics=("parallel",),
            vmem_limit_bytes=vmem_limit),
    )(f1, f2flat, seg_m)

    scores = outs[0][:N, :1 + Nn]
    pos = outs[1][:N] if with_pos else None
    return scores, pos


def ngh_scores_ref(f1, f2g, *, P, Nn, with_pos=True):
    """Pure-JAX reference (correctness check only)."""
    s_all = jnp.einsum('nd,nkd->nk', f1.astype(jnp.float32), f2g.astype(jnp.float32))
    ps = s_all[:, :P]
    ns = s_all[:, P:]
    pmax = jnp.max(ps, axis=1, keepdims=True)
    pos = jnp.argmax(ps, axis=1, keepdims=True).astype(jnp.int32)
    return jnp.concatenate([pmax, ns], axis=1), (pos if with_pos else None)


# ----------------------------------------------------------------------------
# NghSampler2 (glue around the kernel)
# ----------------------------------------------------------------------------
class NghSampler2Pallas:
    def __init__(self, ngh, subq=1, subd=1, pos_d=0, neg_d=2, border=None,
                 maxpool_pos=True, subd_neg=0, tile_n=512):
        assert 0 <= pos_d < neg_d <= (ngh if ngh else 99)
        assert subd <= ngh or ngh == 0
        assert subq != 0
        self.ngh, self.pos_d, self.neg_d = ngh, pos_d, neg_d
        self.sub_q, self.sub_d, self.sub_d_neg = subq, subd, subd_neg
        if border is None:
            border = ngh
        assert border >= ngh, 'border has to be larger than ngh'
        self.border = border
        self.maxpool_pos = maxpool_pos
        assert maxpool_pos, "only the default maxpool_pos=True path is implemented"
        # TODO(synk): subd_neg != 0 distractor branch (extra feat1 @ distractors^T matmul)
        assert subd_neg == 0
        self.pos_offsets, self.neg_offsets = precompute_offsets(ngh, subd, pos_d, neg_d)
        self.all_offsets = np.concatenate([self.pos_offsets, self.neg_offsets], axis=1)
        self.P = int(self.pos_offsets.shape[1])
        self.Nn = int(self.neg_offsets.shape[1])
        self.tile_n = tile_n

    def gen_grid(self, step, B, H, W):
        # TODO(synk): step < 0 (random query grid via torch.randint) not reproduced
        assert step > 0
        x1 = np.arange(self.border, W - self.border, step)
        y1 = np.arange(self.border, H - self.border, step)
        H1, W1 = len(y1), len(x1)
        b1 = np.arange(B)
        x1g = np.broadcast_to(x1[None, None, :], (B, H1, W1)).reshape(-1)
        y1g = np.broadcast_to(y1[None, :, None], (B, H1, W1)).reshape(-1)
        b1g = np.broadcast_to(b1[:, None, None], (B, H1, W1)).reshape(-1)
        return b1g, y1g, x1g, (B, H1, W1)

    def __call__(self, feats, confs, aflow, use_pallas=True):
        B, two, H, W = aflow.shape
        assert two == 2
        feat1, feat2 = feats[0], feats[1]
        conf1, conf2 = (confs[0], confs[1]) if confs else (None, None)

        b1, y1, x1, shape = self.gen_grid(self.sub_q, B, H, W)
        N = b1.shape[0]
        P, Nn = self.P, self.Nn

        # NCHW -> NHWC so the per-pixel D-vector gathers are lane-dense (XLA glue)
        f1hw = jnp.transpose(feat1, (0, 2, 3, 1))       # (B, H, W, D)
        f2hw = jnp.transpose(feat2, (0, 2, 3, 1))

        f1g = f1hw[b1, y1, x1]                          # (N, D)
        qconf = conf1[b1, 0, y1, x1].reshape(shape) if confs else None

        af = aflow[b1, :, y1, x1]                       # (N, 2)
        xy2 = (af + 0.5).astype(jnp.int32).T            # (2, N)  trunc == torch .long()
        mask = ((xy2[0] >= 0) & (xy2[1] >= 0) &
                (xy2[0] < W) & (xy2[1] < H)).reshape(shape)

        def clamp(xy):
            return jnp.stack([jnp.clip(xy[0], 0, W - 1),
                              jnp.clip(xy[1], 0, H - 1)], axis=0)

        # gather feat2 at every [pos | neg] offset in one shot -> (N, K, D)
        all_off = jnp.asarray(self.all_offsets)         # (2, K)
        xy2a = clamp(xy2[:, :, None] + all_off[:, None, :])   # (2, N, K)
        b2 = jnp.asarray(b1)
        f2g = f2hw[b2[:, None], xy2a[1], xy2a[0]]       # (N, K, D)
        # TODO(synk): fuse this neighbourhood gather into the kernel (manual DMA
        # from feat2 in HBM) instead of materializing the (P+Nn)x expansion.

        if use_pallas:
            scores, pos = ngh_scores_pallas(f1g, f2g, P=P, Nn=Nn,
                                            with_pos=bool(confs), tn=self.tile_n)
        else:
            scores, pos = ngh_scores_ref(f1g, f2g, P=P, Nn=Nn, with_pos=bool(confs))

        if confs:
            pos_off = jnp.asarray(self.pos_offsets)     # (2, P)
            sel = clamp(xy2 + pos_off[:, pos[:, 0]])    # (2, N)
            qconf = (qconf + conf2[b2, 0, sel[1], sel[0]].reshape(shape)) / 2

        gt = jnp.zeros((N, 1 + Nn), dtype=jnp.uint8).at[:, :1].set(1)
        return scores, gt, mask, qconf


# ----------------------------------------------------------------------------
if __name__ == "__main__":
    key = jax.random.PRNGKey(0)
    B, D, H, W = 2, 32, 16, 16
    k1, k2, k3, k4, k5 = jax.random.split(key, 5)

    feat1 = jax.random.normal(k1, (B, D, H, W), dtype=jnp.float32)
    feat2 = jax.random.normal(k2, (B, D, H, W), dtype=jnp.float32)
    conf1 = jax.random.uniform(k3, (B, 1, H, W), dtype=jnp.float32)
    conf2 = jax.random.uniform(k4, (B, 1, H, W), dtype=jnp.float32)
    # flow values partially out of bounds to exercise the mask / clamp paths
    aflow = jax.random.uniform(k5, (B, 2, H, W), dtype=jnp.float32,
                               minval=-2.0, maxval=18.0)

    sampler = NghSampler2Pallas(ngh=4, subq=2, subd=1, pos_d=1, neg_d=2)

    scores, gt, mask, qconf = sampler((feat1, feat2), (conf1, conf2), aflow,
                                      use_pallas=True)
    jax.block_until_ready((scores, gt, mask, qconf))

    # pure-JAX reference for validation
    scores_r, gt_r, mask_r, qconf_r = sampler((feat1, feat2), (conf1, conf2), aflow,
                                              use_pallas=False)
    jax.block_until_ready((scores_r, gt_r, mask_r, qconf_r))

    assert scores.shape == scores_r.shape and scores.dtype == jnp.float32
    assert gt.dtype == jnp.uint8 and bool(jnp.all(gt == gt_r))
    assert bool(jnp.all(mask == mask_r))
    # tolerance covers MXU accumulation-order differences and the <=2^-24
    # relative residual of the 3-pass bf16 hi/mid/lo segment-sum split
    np.testing.assert_allclose(np.asarray(scores), np.asarray(scores_r),
                               rtol=1e-4, atol=2e-4)
    np.testing.assert_allclose(np.asarray(qconf), np.asarray(qconf_r),
                               rtol=1e-4, atol=2e-4)

    # also exercise the confs=None variant (argmax output statically disabled)
    s2, g2, m2, q2 = sampler((feat1, feat2), None, aflow, use_pallas=True)
    jax.block_until_ready((s2, g2, m2))
    assert q2 is None and s2.shape == scores.shape
    np.testing.assert_allclose(np.asarray(s2), np.asarray(scores),
                               rtol=1e-4, atol=2e-4)

    print("KERNEL_OK")
</pallas_src>

<mosaic_0001>
module attributes {stable_mosaic.version = 11 : i64} {
  func.func @_scores_kernel(%arg0: i32, %arg1: memref<16x32xf32, #tpu.memory_space<vmem>>, %arg2: memref<16x1536xf32, #tpu.memory_space<vmem>>, %arg3: memref<1536x128xbf16, #tpu.memory_space<vmem>>, %arg4: memref<16x128xf32, #tpu.memory_space<vmem>>, %arg5: memref<16x1xi32, #tpu.memory_space<vmem>>) attributes {dimension_semantics = [#tpu.dimension_semantics<parallel>], iteration_bounds = array<i64: 2>, scalar_prefetch = 0 : i64, scratch_operands = 0 : i64, tpu.core_type = #tpu.core_type<tc>, window_params = [{transform_indices = @transform_0, window_bounds = array<i64: 16, 32>}, {transform_indices = @transform_1, window_bounds = array<i64: 16, 1536>}, {pipeline_mode = #tpu.pipeline_mode<synchronous>, transform_indices = @transform_2, window_bounds = array<i64: 1536, 128>}, {transform_indices = @transform_3, window_bounds = array<i64: 16, 128>}, {transform_indices = @transform_4, window_bounds = array<i64: 16, 1>}]} {
    %c0 = arith.constant 0 : index
    %c0_0 = arith.constant 0 : index
    %0 = vector.load %arg1[%c0, %c0_0] : memref<16x32xf32, #tpu.memory_space<vmem>>, vector<16x32xf32>
    %c0_1 = arith.constant 0 : index
    %c0_2 = arith.constant 0 : index
    %1 = vector.load %arg2[%c0_1, %c0_2] : memref<16x1536xf32, #tpu.memory_space<vmem>>, vector<16x1536xf32>
    %cst = arith.constant 0.000000e+00 : f32
    %2 = vector.broadcast %cst : f32 to vector<16x96xf32>
    %3 = tpu.concatenate %0, %0, %0, %0, %0, %0, %0, %0, %0, %0, %0, %0, %0, %0, %0, %0 in 1 : vector<16x32xf32>, vector<16x32xf32>, vector<16x32xf32>, vector<16x32xf32>, vector<16x32xf32>, vector<16x32xf32>, vector<16x32xf32>, vector<16x32xf32>, vector<16x32xf32>, vector<16x32xf32>, vector<16x32xf32>, vector<16x32xf32>, vector<16x32xf32>, vector<16x32xf32>, vector<16x32xf32>, vector<16x32xf32> -> vector<16x512xf32>
    %4 = tpu.concatenate %0, %0, %0, %0, %0, %0, %0, %0, %0, %0, %0, %0, %0, %0, %0, %0 in 1 : vector<16x32xf32>, vector<16x32xf32>, vector<16x32xf32>, vector<16x32xf32>, vector<16x32xf32>, vector<16x32xf32>, vector<16x32xf32>, vector<16x32xf32>, vector<16x32xf32>, vector<16x32xf32>, vector<16x32xf32>, vector<16x32xf32>, vector<16x32xf32>, vector<16x32xf32>, vector<16x32xf32>, vector<16x32xf32> -> vector<16x512xf32>
    %5 = tpu.concatenate %0, %0, %0, %0, %0, %0, %0, %0, %0, %0, %0, %0, %0, %2 in 1 : vector<16x32xf32>, vector<16x32xf32>, vector<16x32xf32>, vector<16x32xf32>, vector<16x32xf32>, vector<16x32xf32>, vector<16x32xf32>, vector<16x32xf32>, vector<16x32xf32>, vector<16x32xf32>, vector<16x32xf32>, vector<16x32xf32>, vector<16x32xf32>, vector<16x96xf32> -> vector<16x512xf32>
    %6 = tpu.concatenate %3, %4, %5 in 1 : vector<16x512xf32>, vector<16x512xf32>, vector<16x512xf32> -> vector<16x1536xf32>
    %7 = arith.mulf %1, %6 : vector<16x1536xf32>
    %c0_3 = arith.constant 0 : index
    %c0_4 = arith.constant 0 : index
    %8 = vector.load %arg3[%c0_3, %c0_4] : memref<1536x128xbf16, #tpu.memory_space<vmem>>, vector<1536x128xbf16>
    %9 = arith.truncf %7 : vector<16x1536xf32> to vector<16x1536xbf16>
    %10 = arith.extf %9 : vector<16x1536xbf16> to vector<16x1536xf32>
    %11 = arith.subf %7, %10 : vector<16x1536xf32>
    %12 = arith.truncf %11 : vector<16x1536xf32> to vector<16x1536xbf16>
    %13 = arith.extf %12 : vector<16x1536xbf16> to vector<16x1536xf32>
    %14 = arith.subf %11, %13 : vector<16x1536xf32>
    %15 = arith.truncf %14 : vector<16x1536xf32> to vector<16x1536xbf16>
    %cst_5 = arith.constant dense<0.000000e+00> : vector<16x128xf32>
    %16 = tpu.matmul %9, %8, %cst_5 {dimension_numbers = #tpu.dot_dimension_numbers<[1], [0], [0], [1], [0, 0, 1, 1], [], []>} : vector<16x1536xbf16>, vector<1536x128xbf16>, vector<16x128xf32> -> vector<16x128xf32>
    %cst_6 = arith.constant dense<0.000000e+00> : vector<16x128xf32>
    %17 = tpu.matmul %12, %8, %cst_6 {dimension_numbers = #tpu.dot_dimension_numbers<[1], [0], [0], [1], [0, 0, 1, 1], [], []>} : vector<16x1536xbf16>, vector<1536x128xbf16>, vector<16x128xf32> -> vector<16x128xf32>
    %18 = arith.addf %16, %17 : vector<16x128xf32>
    %cst_7 = arith.constant dense<0.000000e+00> : vector<16x128xf32>
    %19 = tpu.matmul %15, %8, %cst_7 {dimension_numbers = #tpu.dot_dimension_numbers<[1], [0], [0], [1], [0, 0, 1, 1], [], []>} : vector<16x1536xbf16>, vector<1536x128xbf16>, vector<16x128xf32> -> vector<16x128xf32>
    %20 = arith.addf %18, %19 : vector<16x128xf32>
    %21 = tpu.iota {dimensions = array<i32: 1>} : vector<16x128xi32>
    %c41_i32 = arith.constant 41 : i32
    %22 = vector.broadcast %c41_i32 : i32 to vector<16x128xi32>
    %23 = arith.cmpi sge, %21, %22 : vector<16x128xi32>
    %c46_i32 = arith.constant 46 : i32
    %24 = vector.broadcast %c46_i32 : i32 to vector<16x128xi32>
    %25 = arith.cmpi slt, %21, %24 : vector<16x128xi32>
    %26 = arith.andi %23, %25 : vector<16x128xi1>
    %cst_8 = arith.constant 0xFF800000 : f32
    %27 = vector.broadcast %cst_8 : f32 to vector<16x128xf32>
    %28 = arith.select %26, %20, %27 : vector<16x128xi1>, vector<16x128xf32>
    %cst_9 = arith.constant dense<0xFF800000> : vector<16xf32>
    %29 = vector.multi_reduction <maximumf>, %28, %cst_9 [1] : vector<16x128xf32> to vector<16xf32>
    %30 = vector.shape_cast %29 : vector<16xf32> to vector<16x1xf32>
    %c0_i32 = arith.constant 0 : i32
    %31 = vector.broadcast %c0_i32 : i32 to vector<16x128xi32>
    %32 = arith.cmpi eq, %21, %31 : vector<16x128xi32>
    %33 = vector.shape_cast %30 : vector<16x1xf32> to vector<16x1xf32>
    %34 = vector.broadcast %33 : vector<16x1xf32> to vector<16x128xf32>
    %35 = arith.select %32, %34, %20 : vector<16x128xi1>, vector<16x128xf32>
    %c0_10 = arith.constant 0 : index
    %c0_11 = arith.constant 0 : index
    %36 = vector.load %arg4[%c0_10, %c0_11] : memref<16x128xf32, #tpu.memory_space<vmem>>, vector<16x128xf32>
    tpu.vector_store %arg4[%c0_10, %c0_11], %35 {strides = array<i32>} : memref<16x128xf32, #tpu.memory_space<vmem>>, vector<16x128xf32>,
    %37 = vector.broadcast %30 : vector<16x1xf32> to vector<16x128xf32>
    %38 = arith.cmpf oeq, %28, %37 : vector<16x128xf32>
    %39 = arith.andi %26, %38 : vector<16x128xi1>
    %c41_i32_12 = arith.constant 41 : i32
    %40 = vector.broadcast %c41_i32_12 : i32 to vector<16x128xi32>
    %41 = arith.subi %21, %40 : vector<16x128xi32>
    %c5_i32 = arith.constant 5 : i32
    %42 = vector.broadcast %c5_i32 : i32 to vector<16x128xi32>
    %43 = arith.select %39, %41, %42 : vector<16x128xi1>, vector<16x128xi32>
    %cst_13 = arith.constant dense<2147483647> : vector<16xi32>
    %44 = vector.multi_reduction <minsi>, %43, %cst_13 [1] : vector<16x128xi32> to vector<16xi32>
    %45 = vector.shape_cast %44 : vector<16xi32> to vector<16x1xi32>
    %c4_i32 = arith.constant 4 : i32
    %46 = vector.broadcast %c4_i32 : i32 to vector<16x1xi32>
    %47 = arith.minsi %45, %46 : vector<16x1xi32>
    %c0_14 = arith.constant 0 : index
    %c0_15 = arith.constant 0 : index
    %48 = vector.load %arg5[%c0_14, %c0_15] : memref<16x1xi32, #tpu.memory_space<vmem>>, vector<16x1xi32>
    tpu.vector_store %arg5[%c0_14, %c0_15], %47 {strides = array<i32>} : memref<16x1xi32, #tpu.memory_space<vmem>>, vector<16x1xi32>,
    return
  }
  func.func @transform_0(%arg0: i32) -> (i32, i32) {
    %c0_i32 = arith.constant 0 : i32
    %c0_i32_0 = arith.constant 0 : i32
    return %arg0, %c0_i32 : i32, i32
  }
  func.func @transform_1(%arg0: i32) -> (i32, i32) {
    %c0_i32 = arith.constant 0 : i32
    %c0_i32_0 = arith.constant 0 : i32
    return %arg0, %c0_i32 : i32, i32
  }
  func.func @transform_2(%arg0: i32) -> (i32, i32) {
    %c0_i32 = arith.constant 0 : i32
    %c0_i32_0 = arith.constant 0 : i32
    %c0_i32_1 = arith.constant 0 : i32
    return %c0_i32, %c0_i32_0 : i32, i32
  }
  func.func @transform_3(%arg0: i32) -> (i32, i32) {
    %c0_i32 = arith.constant 0 : i32
    %c0_i32_0 = arith.constant 0 : i32
    return %arg0, %c0_i32 : i32, i32
  }
  func.func @transform_4(%arg0: i32) -> (i32, i32) {
    %c0_i32 = arith.constant 0 : i32
    %c0_i32_0 = arith.constant 0 : i32
    return %arg0, %c0_i32 : i32, i32
  }
}

</mosaic_0001>

<bundles_post_ra>
// kernel: tpu_custom_call.1
= control target key start
LH: loop header
LB: loop body
LE: loop exit
PB: predicated region body
PF: predicated region fallthrough
CT: control target
= control target key end

     0   :  { %s4234_s0 = inlined_call_operand.hbm [shape: f32[32,32], index: 0, kind: input, shape index: {}]   ;;  %s4235_s1 = inlined_call_operand.hbm [shape: f32[32,1536], index: 1, kind: input, shape index: {}]   ;;  %s4236_s2 = inlined_call_operand.hbm [shape: bf16[1536,128], index: 2, kind: input, shape index: {}]   ;;  %s4237_s3 = inlined_call_operand.hbm [shape: f32[32,128], index: 3, kind: output, shape index: {0}]   ;;  %s4238_s4 = inlined_call_operand.vmem [shape: s32[32,1], index: 4, kind: output, shape index: {1}]  }
   0x1   :  { %4337 = sst [smem:[#allocation90_spill]] %s4234_s0 }
   0x2   :  { %4338 = sst [smem:[#allocation91_spill]] %s4236_s2 }
   0x3   :  { %10 = vsyncpa [#allocation3], 0 }
   0x4   :  { %12 = vsyncpa [#allocation3 + $0x1], 0 }
   0x5   :  { %13 = vsyncpa [#allocation6], 0 }
   0x6   :  { %15 = vsyncpa [#allocation6 + $0x1], 0 }
   0x7   :  { %16 = vsyncpa [#allocation4], 0 }
   0x8   :  { %18 = vsyncpa [#allocation4 + $0x1], 0  ;;  %s3139_s15 = smov 0   ;;  %s3141_s16 = smov 0  }
   0x9   :  { %s3143_s17 = smov 0   ;;  %s3145_s18 = smov 0  }
   0xa LB: > { %s3160_s19 = sadd.s32 4294967295, %s3097_s18   ;;  %s2221_s20 = sadd.s32 4294967294, %s3097_s18   ;;  %s3097_s18 = sphi %s3145_s18, %s4542_s18   ;;  %s3093_s17 = sphi %s3143_s17, %s4541_s17   ;;  %s3089_s16 = sphi %s3141_s16, %s4540_s16   ;;  %s3085_s15 = sphi %s3139_s15, %s4539_s15  }
   0xb   : > { %p44_p0 = scmp.ne.s32.totalorder %s3089_s16, %s3085_s15  ;;  %p4239_p1 = scmp.eq.s32.totalorder %s3160_s19, 0 }
   0xc   : > { %p121_p3 = scmp.eq.s32.totalorder %s2221_s20, 1  ;;  %p2222_p5 = scmp.ge.s32.totalorder %s3097_s18, 1 }
   0xd   : > { %p3169_p4 = por %p4239_p1, %p44_p0  ;;  %p154_p7 = scmp.lt.s32.totalorder %s3097_s18, 3 }
   0xe   : > { %p3174_p6 = por %p121_p3, %p44_p0  ;;  %s3099_s24 = smov [#allocation7]  }
   0xf   : > { %s4339_s21 = scalar_select %p3169_p4, 1, 0 }
  0x10   : > { %s4340_s22 = scalar_select %p3174_p6, 1, 0 }
  0x11   : > { %p3179_p8 = pnand %p2222_p5, %p154_p7  ;;  %s166_s25 = sshll.u32 %s3099_s24, 4  ;;  %s167_s25 = int_to_ptr.vmem [resolvable:$true] %s166_s25 }
  0x12   : > { %s3193_s27 = sadd.s32 1, %s3097_s18   ;;  %s31_s28 = sadd.s32 1, %s3093_s17 }
  0x13   : > { %p2750_p9 = pneg %p3179_p8  ;;  %s28_s29 = ssub.s32 %s3097_s18, %s3193_s27 }
  0x14   : > { %s2954_s30 = scalar_lea.vmem %s167_s25, 12288  ;;  %p2962_p5 = scmp.lt.s32.totalorder %s167_s25, %s167_s25 }
  0x15   : > { %p3188_p11 = pnand %p2750_p9, %p4239_p1  ;;  %p2955_p13 = scmp.ne.s32.totalorder %s167_s25, %s2954_s30 }
  0x16   : > { %p2963_p7 = scmp.lt.s32.totalorder %s2954_s30, %s2954_s30 }
  0x17   : > { %p2945_p12 = pneg %p3188_p11 }
  0x18   : > { %p2964_p10 = por %p2963_p7, %p2962_p5 }
  0x19   : > { %p2957_p0 = pnand %p2955_p13, %p2945_p12 }
  0x1b   : > { %p2958_p3 = pneg %p2957_p0 }
  0x1d   : > { %p2965_p2 = pnand %p2964_p10, %p2958_p3 }
  0x1f   : > { %2968 = shalt.err (!%p2965_p2)
}
  0x20   : > { %s3100_s5 = smov 64   ;;  %s3101_s6 = smov 4  }
  0x21   : > { %s4343_s2 = sld [smem:[#allocation91_spill]]  ;;  %p29_p9 = scmp.eq.s32.totalorder %s28_s29, 0 }
  0x22   : > { %p38_p12 = scmp.ne.s32.totalorder %s3093_s17, %s3089_s16  ;;  %p39_p10 = scmp.eq.s32.totalorder %s3097_s18, 0 }
  0x23   : > { %p2766_p2 = scmp.lt.s32.totalorder %s3097_s18, 2  ;;  %p4344_p0 = scmp.eq.s32.totalorder %s3160_s19, 1 }
  0x24   : > { %s3210_s9 = scalar_select %p29_p9, %s3093_s17, %s31_s28  }
  0x25   : > { %p40_p13 = por %p39_p10, %p38_p12  ;;  %p3214_p3 = por %p4344_p0, %p38_p12 }
  0x26   : > { %s3219_s11 = sand.u32 1, %s3093_s17   ;;  %s2339_s12 = sshll.u32 %s3097_s18, 8 }
  0x27   : > { %2753 = dma.hbm_to_vmem [thread:$0]  (!%p3188_p11), %s4343_s2, 12288, %s167_s25, [#allocation6], %s3100_s5, %s3100_s5, %s3101_s6  }
  0x28   : > { %s4345_s10 = scalar_select %p3214_p3, 1, 0 }
  0x29   : > { %s2225_s13 = sshll.u32 %s3219_s11, 4  ;;  %s4346_s0 = sld [smem:[#allocation90_spill]] }
  0x2a   : > { %s184_s25 = scalar_lea.vmem [#allocation2], %s2225_s13  ;;  %p3228_p11 = pnand %p2766_p2, %p40_p13 }
  0x2b   : > { %s191_s26 = sshll.u32 %s184_s25, 4  ;;  %s181_s29 = scalar_lea.sflag [#allocation3], %s3219_s11  ;;  %s3232_s26 = int_to_ptr.vmem [resolvable:$true] %s191_s26 }
  0x2c   : > { %p2971_p7 = pneg %p3228_p11 }
  0x2f   : > { %s3226_s24 = scalar_lea.hbm %s4346_s0, %s2339_s12  ;;  %s2974_s7 = scalar_lea.hbm %s4346_s0, 512 }
  0x30   : > { %s2969_s30 = scalar_lea.hbm %s3226_s24, 256  ;;  %p2975_p10 = scmp.lt.s32.totalorder %s3226_s24, %s4346_s0 }
  0x31   : > { %p2970_p5 = scmp.ne.s32.totalorder %s3226_s24, %s2969_s30  ;;  %p2976_p2 = scmp.lt.s32.totalorder %s2974_s7, %s2969_s30 }
  0x33   : > { %p2972_p9 = pnand %p2971_p7, %p2970_p5  ;;  %p2977_p13 = por %p2976_p2, %p2975_p10 }
  0x35   : > { %p2973_p12 = pneg %p2972_p9 }
  0x37   : > { %p2978_p0 = pnand %p2977_p13, %p2973_p12 }
  0x39   : > { %2981 = shalt.err (!%p2978_p0)
}
  0x3a   : > { %s2982_s13 = scalar_lea.vmem %s3232_s26, 256  ;;  %s3102_s14 = smov [#allocation2]  }
  0x3b   : > { %p2983_p1 = scmp.ne.s32.totalorder %s3232_s26, %s2982_s13  ;;  %s2987_s20 = sshll.u32 %s3102_s14, 4  ;;  %s2988_s20 = int_to_ptr.vmem [resolvable:$false] %s2987_s20 }
  0x3c   : > { %s2989_s25 = scalar_lea.vmem %s2988_s20, 512  ;;  %p2990_p6 = scmp.lt.s32.totalorder %s3232_s26, %s2988_s20 }
  0x3d   : > { %p2985_p5 = pnand %p2983_p1, %p2971_p7  ;;  %p2991_p3 = scmp.lt.s32.totalorder %s2989_s25, %s2982_s13 }
  0x3f   : > { %p2986_p9 = pneg %p2985_p5  ;;  %p2992_p4 = por %p2991_p3, %p2990_p6 }
  0x41   : > { %p2993_p10 = pnand %p2992_p4, %p2986_p9 }
  0x43   : > { %2996 = shalt.err (!%p2993_p10)
}
  0x44   : > { %s3103_s30 = smov 128   ;;  %s3104_s5 = smov 8  }
  0x45   : > { %2757 = dma.hbm_to_vmem [thread:$0]  (!%p3228_p11), %s3226_s24, 256, %s3232_s26, %s181_s29, %s3103_s30, %s3103_s30, %s3104_s5  }
  0x46   : > { %s201_s6 = sand.u32 1, %s3097_s18   ;;  %s2737_s7 = smul.u32 192, %s3219_s11 }
  0x47   : > { %s2738_s8 = smul.u32 3072, %s3097_s18  ;;  %s3271_s0 = scalar_lea.sflag [#allocation6], %s201_s6 }
  0x48   : > { %s205_s20 = scalar_lea.vmem [#allocation5], %s2737_s7  ;;  %s3002_s26 = scalar_lea.hbm %s4235_s1, 6144 }
  0x49   : > { %s3267_s14 = scalar_lea.hbm %s4235_s1, %s2738_s8  ;;  %s213_s25 = sshll.u32 %s205_s20, 4  ;;  %s3269_s25 = int_to_ptr.vmem [resolvable:$true] %s213_s25 }
  0x4a   : > { %s2997_s2 = scalar_lea.hbm %s3267_s14, 3072  ;;  %p3003_p3 = scmp.lt.s32.totalorder %s3267_s14, %s4235_s1 }
  0x4b   : > { %p2998_p1 = scmp.ne.s32.totalorder %s3267_s14, %s2997_s2  ;;  %p3004_p12 = scmp.lt.s32.totalorder %s3002_s26, %s2997_s2 }
  0x4d   : > { %p3000_p4 = pnand %p2998_p1, %p2971_p7  ;;  %p3005_p2 = por %p3004_p12, %p3003_p3 }
  0x4f   : > { %p3001_p6 = pneg %p3000_p4 }
  0x51   : > { %p3006_p13 = pnand %p3005_p2, %p3001_p6 }
  0x53   : > { %3009 = shalt.err (!%p3006_p13)
}
  0x54   : > { %s3010_s5 = scalar_lea.vmem %s3269_s25, 3072  ;;  %s3105_s6 = smov [#allocation5]  }
  0x55   : > { %p3011_p0 = scmp.ne.s32.totalorder %s3269_s25, %s3010_s5  ;;  %s3015_s7 = sshll.u32 %s3105_s6, 4  ;;  %s3016_s7 = int_to_ptr.vmem [resolvable:$false] %s3015_s7 }
  0x56   : > { %s3017_s8 = scalar_lea.vmem %s3016_s7, 6144  ;;  %p3018_p10 = scmp.lt.s32.totalorder %s3269_s25, %s3016_s7 }
  0x57   : > { %p3013_p5 = pnand %p3011_p0, %p2971_p7  ;;  %p3019_p1 = scmp.lt.s32.totalorder %s3017_s8, %s3010_s5 }
  0x59   : > { %p3014_p9 = pneg %p3013_p5  ;;  %p3020_p4 = por %p3019_p1, %p3018_p10 }
  0x5b   : > { %p3021_p3 = pnand %p3020_p4, %p3014_p9 }
  0x5d   : > { %3024 = shalt.err (!%p3021_p3)
}
  0x5e   : > { %s3106_s2 = smov 1536   ;;  %s3107_s12 = smov 96  }
  0x5f   : > { %2760 = dma.hbm_to_vmem [thread:$0]  (!%p3228_p11), %s3267_s14, 3072, %s3269_s25, %s3271_s0, %s3106_s2, %s3106_s2, %s3107_s12  }
  0x60   : > { %225 = sbr.rel (%p3179_p8) target bundleno = 1143 (0x477), region = 32 }
  0x65   : > { %s3299_s13 = sand.u32 1, %s3089_s16   ;;  %p4348_p7 = scmp.ne.s32.totalorder %s4339_s21, 0 }
  0x66   : > { %s2232_s20 = sshll.u32 %s3299_s13, 4  ;;  %s228_s11 = scalar_lea.sflag [#allocation3], %s3299_s13 }
  0x67   : > { %s231_s24 = scalar_lea.vmem [#allocation2], %s2232_s20 }
  0x68   : > { %3068 = dma.done.wait (%p4348_p7), %s228_s11, 256  }
  0x69   : > { %3070 = vsyncadd (%p4348_p7), %s228_s11, 4294967040  ;;  %s236_s0 = sand.u32 1, %s3160_s19   ;;  %s2739_s23 = smul.u32 192, %s3299_s13 }
  0x6a   : > { %s237_s28 = scalar_lea.sflag [#allocation6], %s236_s0 }
  0x6b   : > { %s3311_s14 = scalar_lea.vmem [#allocation5], %s2739_s23 }
  0x6c   : > { %3072 = dma.done.wait (%p4348_p7), %s237_s28, 3072  }
  0x6d   : > { %3074 = vsyncadd (%p4348_p7), %s237_s28, 4294964224  ;;  %p4349_p8 = scmp.eq.s32.totalorder %s3160_s19, 0 }
  0x6f   : > { %3076 = dma.done.wait (%p4349_p8), [#allocation6], 12288   ;;  %p4350_p11 = pmov %p4349_p8 }
  0x70   : > { %v3321_v0 = vld [vmem:[%s231_s24] sm:$0xff]  ;;  %v3323_v1 = vld [vmem:[%s231_s24 + $0x8] sm:$0xff]  ;;  %s3108_s25 = smov 64   ;;  %s3109_s26 = smov 32   ;;  %vm335_vm0 = vcmask 261120   ;;  %vm338_vm1 = vcmask 523264  }
  0x71   : > { %3078 = vsyncadd (%p4350_p11), [#allocation6], 4294955008  ;;  %323 = vrot.lane.b32.xlu1 %v3321_v0, %s3108_s25  ;;  %317 = vrot.lane.b32.xlu0 %v3321_v0, %s3109_s26  ;;  %v2813_v2 = vld [vmem:[#allocation7 + $0x78] sm:$0xff]   ;;  %v2817_v6 = vld [vmem:[#allocation7 + $0x70] sm:$0xff]   ;;  %s3110_s21 = smov 96   ;;  %v344_v40 = vsel %vm335_vm0, %v3321_v0, 0.0 }
  0x72   : > { %v2814_v3 = vld [vmem:[#allocation7 + $0xf8] sm:$0xff]   ;;  %2341 = vmatprep.subr.bf16.mxu0 %v2813_v2  ;;  %v2818_v7 = vld [vmem:[#allocation7 + $0xf0] sm:$0xff]   ;;  %v2821_v10 = vld [vmem:[#allocation7 + $0x68] sm:$0xff]   ;;  %v345_v41 = vsel %vm335_vm0, %v3323_v1, 0.0  ;;  %vm341_vm2 = vcmask 785408   ;;  %s4172_s29 = scalar_lea.vmem [#allocation8], %s2232_s20 }
  0x73   : > { %v2815_v4 = vld [vmem:[#allocation7 + $0x38] sm:$0xff]   ;;  %2363 = vmatprep.subr.bf16.mxu1 %v2814_v3  ;;  %v2819_v8 = vld [vmem:[#allocation7 + $0x30] sm:$0xff]   ;;  %v2822_v11 = vld [vmem:[#allocation7 + $0xe8] sm:$0xff]   ;;  %s2087_s30 = sshll.u32 %s4172_s29, 4  ;;  %s2340_s5 = sshll.u32 %s3160_s19, 8  ;;  %s4181_s30 = int_to_ptr.vmem [resolvable:$true] %s2087_s30 }
  0x74   : > { %v2816_v5 = vld [vmem:[#allocation7 + $0xb8] sm:$0xff]   ;;  %2342 = vmatpush3.bf16.msra.mxu0 %v2815_v4  ;;  %v2820_v9 = vld [vmem:[#allocation7 + $0xb0] sm:$0xff]   ;;  %v2823_v12 = vld [vmem:[#allocation7 + $0x28] sm:$0xff]   ;;  %s4187_s8 = scalar_lea.hbm %s4237_s3, %s2340_s5  ;;  %s2069_s2 = scalar_lea.sflag [#allocation4], %s3299_s13 }
  0x75   : > { %325 = vrot.lane.b32.xlu1 %v3323_v1, %s3108_s25  ;;  %319 = vrot.lane.b32.xlu0 %v3323_v1, %s3109_s26  ;;  %v2824_v13 = vld [vmem:[#allocation7 + $0xa8] sm:$0xff]   ;;  %v2825_v14 = vld [vmem:[#allocation7 + $0x60] sm:$0xff]   ;;  %v2829_v18 = vld [vmem:[#allocation7 + $0x58] sm:$0xff]   ;;  %s3025_s12 = scalar_lea.vmem %s4181_s30, 256  ;;  %p4536_p12 = scmp.ne.s32.totalorder %s4345_s10, 0 }
  0x76   : > { %2364 = vmatpush3.bf16.msra.mxu1 %v2816_v5  ;;  %2343 = vmatprep.subr.bf16.mxu0 %v2817_v6  ;;  %v2826_v15 = vld [vmem:[#allocation7 + $0xe0] sm:$0xff]   ;;  %v2830_v19 = vld [vmem:[#allocation7 + $0xd8] sm:$0xff]   ;;  %v2833_v22 = vld [vmem:[#allocation7 + $0x50] sm:$0xff]   ;;  %p3026_p6 = scmp.ne.s32.totalorder %s4181_s30, %s3025_s12  ;;  %s3111_s20 = smov [#allocation8]  }
  0x77   : > { %2365 = vmatprep.subr.bf16.mxu1 %v2818_v7  ;;  %v2827_v16 = vld [vmem:[#allocation7 + $0x20] sm:$0xff]   ;;  %v2831_v20 = vld [vmem:[#allocation7 + $0x18] sm:$0xff]   ;;  %v2834_v23 = vld [vmem:[#allocation7 + $0xd0] sm:$0xff]   ;;  %s3029_s11 = sshll.u32 %s3111_s20, 4  ;;  %s3030_s11 = int_to_ptr.vmem [resolvable:$false] %s3029_s11 }
  0x78   : > { %2344 = vmatpush3.bf16.msra.mxu0 %v2819_v8  ;;  %v2828_v17 = vld [vmem:[#allocation7 + $0xa0] sm:$0xff]   ;;  %v2832_v21 = vld [vmem:[#allocation7 + $0x98] sm:$0xff]   ;;  %v2835_v24 = vld [vmem:[#allocation7 + $0x10] sm:$0xff]   ;;  %p3027_p2 = pnand %p3026_p6, %p4536_p12  ;;  %s3031_s24 = scalar_lea.vmem %s3030_s11, 512 }
  0x79   : > { %331 = vrot.lane.b32.xlu1 %v3323_v1, %s3110_s21  ;;  %329 = vrot.lane.b32.xlu0 %v3321_v0, %s3110_s21  ;;  %v2836_v25 = vld [vmem:[#allocation7 + $0x90] sm:$0xff]   ;;  %v2837_v26 = vld [vmem:[#allocation7 + $0x48] sm:$0xff]   ;;  %v3335_v30 = vld [vmem:[#allocation7 + $0x40] sm:$0xff]   ;;  %p3032_p0 = scmp.lt.s32.totalorder %s4181_s30, %s3030_s11  ;;  %p3033_p5 = scmp.lt.s32.totalorder %s3031_s24, %s3025_s12 }
  0x7a   : > { %2366 = vmatpush3.bf16.msra.mxu1 %v2820_v9  ;;  %2345 = vmatprep.subr.bf16.mxu0 %v2821_v10  ;;  %v2838_v27 = vld [vmem:[#allocation7 + $0xc8] sm:$0xff]   ;;  %v3339_v31 = vld [vmem:[#allocation7 + $0xc0] sm:$0xff]   ;;  %v3349_v34 = vld [vmem:[#allocation7 + $0x178] sm:$0xff]   ;;  %p3028_p13 = pneg %p3027_p2 }
  0x7b   : > { %2367 = vmatprep.subr.bf16.mxu1 %v2822_v11  ;;  %v3331_v28 = vld [vmem:[#allocation7 + $0x8] sm:$0xff]   ;;  %v3342_v32 = vld [vmem:[#allocation7] sm:$0xff]   ;;  %v3351_v35 = vld [vmem:[#allocation7 + $0x1f8] sm:$0xff]   ;;  %p3034_p9 = por %p3033_p5, %p3032_p0 }
  0x7c   : > { %2346 = vmatpush3.bf16.msra.mxu0 %v2823_v12  ;;  %v3333_v29 = vld [vmem:[#allocation7 + $0x88] sm:$0xff]   ;;  %v3345_v33 = vld [vmem:[#allocation7 + $0x80] sm:$0xff]   ;;  %v302_v38 = vld [vmem:[%s3311_s14 + $0x58] sm:$0xff] }
  0x7d   : > { %2347 = vmatprep.subr.bf16.mxu0 %v2825_v14  ;;  %v314_v39 = vld [vmem:[%s3311_s14 + $0xb8] sm:$0xff]  ;;  %v3361_v46 = vmul.f32 %v344_v40, %v302_v38  ;;  %v292_v48 = vld [vmem:[%s3311_s14 + $0x8] sm:$0xff]  ;;  %v291_v52 = vld [vmem:[%s3311_s14] sm:$0xff]  ;;  %p3035_p10 = pnand %p3034_p9, %p3028_p13 }
  0x7e   : > { %2368 = vmatpush3.bf16.msra.mxu1 %v2824_v13  ;;  %v3363_v47 = vmul.f32 %v345_v41, %v314_v39  ;;  %v304_v49 = vld [vmem:[%s3311_s14 + $0x68] sm:$0xff]  ;;  %v294_v50 = vld [vmem:[%s3311_s14 + $0x18] sm:$0xff]  ;;  %v303_v57 = vld [vmem:[%s3311_s14 + $0x60] sm:$0xff] }
  0x7f   : > { %2369 = vmatprep.subr.bf16.mxu1 %v2826_v15  ;;  %v306_v51 = vld [vmem:[%s3311_s14 + $0x78] sm:$0xff]  ;;  %v293_v58 = vld [vmem:[%s3311_s14 + $0x10] sm:$0xff]  ;;  %v296_v62 = vld [vmem:[%s3311_s14 + $0x28] sm:$0xff] }
  0x80   : > { %2348 = vmatpush3.bf16.msra.mxu0 %v2827_v16  ;;  %v305_v59 = vld [vmem:[%s3311_s14 + $0x70] sm:$0xff]  ;;  %v308_v63 = vld [vmem:[%s3311_s14 + $0x88] sm:$0xff]  ;;  %v298_v5 = vld [vmem:[%s3311_s14 + $0x38] sm:$0xff] }
  0x81   : > { %2349 = vmatprep.subr.bf16.mxu0 %v2829_v18  ;;  %v310_v6 = vld [vmem:[%s3311_s14 + $0x98] sm:$0xff]  ;;  %v295_v39 = vld [vmem:[%s3311_s14 + $0x20] sm:$0xff] }
  0x82   : > { %2370 = vmatpush3.bf16.msra.mxu1 %v2828_v17  ;;  %v307_v40 = vld [vmem:[%s3311_s14 + $0x80] sm:$0xff] }
  0x83   : > { %2371 = vmatprep.subr.bf16.mxu1 %v2830_v19 }
  0x84   : > { %2350 = vmatpush3.bf16.msra.mxu0 %v2831_v20 }
  0x85   : > { %2351 = vmatprep.subr.bf16.mxu0 %v2833_v22 }
  0x86   : > { %2372 = vmatpush3.bf16.msra.mxu1 %v2832_v21 }
  0x87   : > { %2373 = vmatprep.subr.bf16.mxu1 %v2834_v23 }
  0x88   : > { %2352 = vmatpush3.bf16.msra.mxu0 %v2835_v24 }
  0x89   : > { %2353 = vmatprep.subr.bf16.mxu0 %v2837_v26 }
  0x8a   : > { %2374 = vmatpush3.bf16.msra.mxu1 %v2836_v25 }
  0x8b   : > { %2375 = vmatprep.subr.bf16.mxu1 %v2838_v27 }
  0x8c   : > { %2354 = vmatpush3.bf16.msra.mxu0 %v3331_v28 }
  0x8d   : > { %2355 = vmatprep.subr.bf16.mxu0 %v3335_v30 }
  0x8e   : > { %2376 = vmatpush3.bf16.msra.mxu1 %v3333_v29 }
  0x8f   : > { %2377 = vmatprep.subr.bf16.mxu1 %v3339_v31 }
  0x90   : > { %2356 = vmatpush3.bf16.msra.mxu0 %v3342_v32 }
  0x91   : > { %2385 = vmatprep.subr.bf16.mxu0 %v3349_v34 }
  0x92   : > { %2378 = vmatpush3.bf16.msra.mxu1 %v3345_v33 }
  0x93   : > { %2407 = vmatprep.subr.bf16.mxu1 %v3351_v35 }
  0xe3   : > { %v324_v36 = vpop.permute.xlu1 %323  ;;  %v318_v37 = vpop.permute.xlu0 %317 }
  0xe4   : > { %v336_v44 = vsel %vm335_vm0, %v3321_v0, %v318_v37  ;;  %v3381_v0 = vpack.c.bf16 %v3363_v47, %v3361_v46 }
  0xe5   : > { %v339_v55 = vsel %vm338_vm1, %v336_v44, %v324_v36 }
  0xe7   : > { %v326_v42 = vpop.permute.xlu1 %325  ;;  %v320_v43 = vpop.permute.xlu0 %319 }
  0xe8   : > { %v337_v45 = vsel %vm335_vm0, %v3323_v1, %v320_v43 }
  0xe9   : > { %v340_v54 = vsel %vm338_vm1, %v337_v45, %v326_v42 }
  0xeb   : > { %v332_v53 = vpop.permute.xlu1 %331  ;;  %v330_v56 = vpop.permute.xlu0 %329 }
  0xec   : > { %v3373_v60 = vsel %vm341_vm2, %v340_v54, %v332_v53  ;;  %v3375_v61 = vsel %vm341_vm2, %v339_v55, %v330_v56  ;;  %v3442_v55 = vld [vmem:[#allocation7 + $0x170] sm:$0xff]  }
  0xed   : > { %v347_v1 = vmul.f32 %v3375_v61, %v292_v48  ;;  %v359_v2 = vmul.f32 %v3373_v60, %v304_v49  ;;  %v349_v3 = vmul.f32 %v3375_v61, %v294_v50  ;;  %v361_v4 = vmul.f32 %v3373_v60, %v306_v51  ;;  %v3433_v49 = vld [vmem:[#allocation7 + $0x138] sm:$0xff]   ;;  %4355 = vst [vmem:[#allocation17_spill] sm:$0xff] %v3442_v55 }
  0xee   : > { %v346_v7 = vmul.f32 %v3375_v61, %v291_v52  ;;  %v358_v8 = vmul.f32 %v3373_v60, %v303_v57  ;;  %v348_v9 = vmul.f32 %v3375_v61, %v293_v58  ;;  %v360_v10 = vmul.f32 %v3373_v60, %v305_v59  ;;  %4351 = vst [vmem:[#allocation13_spill] sm:$0xff] %v3433_v49  ;;  %v3435_v50 = vld [vmem:[#allocation7 + $0x1b8] sm:$0xff]  }
  0xef   : > { %v3393_v11 = vpack.c.bf16 %v359_v2, %v347_v1  ;;  %v3395_v12 = vpack.c.bf16 %v361_v4, %v349_v3  ;;  %v351_v13 = vmul.f32 %v3375_v61, %v296_v62  ;;  %v363_v14 = vmul.f32 %v3373_v60, %v308_v63  ;;  %4352 = vst [vmem:[#allocation14_spill] sm:$0xff] %v3435_v50 }
  0xf0   : > { %v3399_v15 = vpack.c.bf16 %v358_v8, %v346_v7  ;;  %v3401_v16 = vpack.c.bf16 %v360_v10, %v348_v9  ;;  %v353_v17 = vmul.f32 %v3375_v61, %v298_v5  ;;  %v3405_v18 = vmul.f32 %v3373_v60, %v310_v6  ;;  %v3458_v6 = vld [vmem:[#allocation7 + $0x130] sm:$0xff]  }
  0xf1   : > { %v575_v19 = vunpack.c.l.bf16 %v3393_v11  ;;  %v587_v20 = vunpack.c.h.bf16 %v3393_v11  ;;  %v577_v21 = vunpack.c.l.bf16 %v3395_v12  ;;  %v589_v22 = vunpack.c.h.bf16 %v3395_v12  ;;  %4357 = vst [vmem:[#allocation19_spill] sm:$0xff] %v3458_v6 }
  0xf2   : > { %v574_v23 = vunpack.c.l.bf16 %v3399_v15  ;;  %v586_v24 = vunpack.c.h.bf16 %v3399_v15  ;;  %v576_v25 = vunpack.c.l.bf16 %v3401_v16  ;;  %v588_v26 = vunpack.c.h.bf16 %v3401_v16 }
  0xf3   : > { %v3415_v27 = vsub.f32 %v347_v1, %v575_v19  ;;  %v3417_v36 = vsub.f32 %v359_v2, %v587_v20  ;;  %v3419_v37 = vsub.f32 %v349_v3, %v577_v21  ;;  %v3421_v38 = vsub.f32 %v361_v4, %v589_v22  ;;  %v3456_v1 = vld [vmem:[#allocation7 + $0x1f0] sm:$0xff]   ;;  %v300_v20 = vld [vmem:[%s3311_s14 + $0x48] sm:$0xff]  ;;  %v299_v22 = vld [vmem:[%s3311_s14 + $0x40] sm:$0xff] }
  0xf4   : > { %v598_v41 = vsub.f32 %v346_v7, %v574_v23  ;;  %v610_v42 = vsub.f32 %v358_v8, %v586_v24  ;;  %v600_v43 = vsub.f32 %v348_v9, %v576_v25  ;;  %v612_v44 = vsub.f32 %v360_v10, %v588_v26  ;;  %4356 = vst [vmem:[#allocation18_spill] sm:$0xff] %v3456_v1  ;;  %v297_v7 = vld [vmem:[%s3311_s14 + $0x30] sm:$0xff]  ;;  %v312_v21 = vld [vmem:[%s3311_s14 + $0xa8] sm:$0xff] }
  0xf5   : > { %v3427_v45 = vpack.c.bf16 %v3417_v36, %v3415_v27  ;;  %v3431_v48 = vpack.c.bf16 %v3421_v38, %v3419_v37  ;;  %v3437_v51 = vpack.c.bf16 %v363_v14, %v351_v13  ;;  %v3440_v52 = vpack.c.bf16 %v3405_v18, %v353_v17  ;;  %v309_v8 = vld [vmem:[%s3311_s14 + $0x90] sm:$0xff] }
  0xf6   : > { %v622_v53 = vpack.c.bf16 %v610_v42, %v598_v41  ;;  %v624_v54 = vpack.c.bf16 %v612_v44, %v600_v43  ;;  %v3445_v56 = vmul.f32 %v3375_v61, %v295_v39  ;;  %v3448_v57 = vmul.f32 %v3373_v60, %v307_v40 }
  0xf7   : > { %4353 = vst [vmem:[#allocation15_spill] sm:$0xff] %v3437_v51  ;;  %4354 = vst [vmem:[#allocation16_spill] sm:$0xff] %v3440_v52  ;;  %1302 = vmatprep.mubr.bf16.mxu0 %v3427_v45  ;;  %1343 = vmatprep.mubr.bf16.mxu1 %v3431_v48  ;;  %v579_v58 = vunpack.c.l.bf16 %v3437_v51  ;;  %v591_v59 = vunpack.c.h.bf16 %v3437_v51  ;;  %v581_v62 = vunpack.c.l.bf16 %v3440_v52  ;;  %v593_v63 = vunpack.c.h.bf16 %v3440_v52 }
  0xf8   : > { %v634_v2 = vunpack.c.l.bf16 %v622_v53  ;;  %v646_v3 = vunpack.c.h.bf16 %v622_v53  ;;  %1303 = vmatmul.mubr.bf16.vlgmr.msra.gmra.mxu0 %v622_v53  ;;  %v636_v4 = vunpack.c.l.bf16 %v624_v54  ;;  %v648_v5 = vunpack.c.h.bf16 %v624_v54  ;;  %1344 = vmatmul.mubr.bf16.vlgmr.msra.gmra.mxu1 %v624_v54  ;;  %v301_v53 = vld [vmem:[%s3311_s14 + $0x50] sm:$0xff] }
  0xf9   : > { %2386 = vmatpush3.bf16.msra.mxu0 %v3433_v49  ;;  %2408 = vmatpush3.bf16.msra.mxu1 %v3435_v50  ;;  %v3464_v9 = vsub.f32 %v351_v13, %v579_v58  ;;  %v3466_v10 = vsub.f32 %v363_v14, %v591_v59  ;;  %v3468_v19 = vsub.f32 %v353_v17, %v581_v62  ;;  %v3483_v13 = vld [vmem:[#allocation7 + $0x1b0] sm:$0xff]   ;;  %v3485_v14 = vld [vmem:[#allocation7 + $0x168] sm:$0xff]   ;;  %v311_v17 = vld [vmem:[%s3311_s14 + $0xa0] sm:$0xff]  ;;  %v647_v23 = vunpack.c.h.bf16 %v3427_v45 }
  0xfa   : > { %v3474_v24 = vsub.f32 %v598_v41, %v634_v2  ;;  %v3476_v25 = vsub.f32 %v610_v42, %v646_v3  ;;  %v3478_v26 = vsub.f32 %v600_v43, %v636_v4  ;;  %v3480_v39 = vsub.f32 %v612_v44, %v648_v5  ;;  %2387 = vmatprep.subr.bf16.mxu0 %v3442_v55  ;;  %v3496_v42 = vld [vmem:[#allocation7 + $0x1e8] sm:$0xff]   ;;  %v3550_v55 = vld [vmem:[#allocation7 + $0x120] sm:$0xff]   ;;  %v3569_v49 = vld [vmem:[#allocation7 + $0x1d8] sm:$0xff]  }
  0xfb   : > { %4362 = vst [vmem:[#allocation24_spill] sm:$0xff] %v3483_v13  ;;  %4363 = vst [vmem:[#allocation25_spill] sm:$0xff] %v3485_v14  ;;  %v3490_v40 = vpack.c.bf16 %v3466_v10, %v3464_v9  ;;  %v3493_v41 = vsub.f32 %v3405_v18, %v593_v63  ;;  %2409 = vmatprep.subr.bf16.mxu1 %v3456_v1  ;;  %v3500_v43 = vpack.c.bf16 %v3448_v57, %v3445_v56  ;;  %v3514_v63 = vld [vmem:[#allocation7 + $0x128] sm:$0xff]  }
  0xfc   : > { %4358 = vst [vmem:[#allocation20_spill] sm:$0xff] %v3474_v24  ;;  %4359 = vst [vmem:[#allocation21_spill] sm:$0xff] %v3476_v25  ;;  %v352_v44 = vmul.f32 %v3375_v61, %v297_v7  ;;  %v364_v54 = vmul.f32 %v3373_v60, %v309_v8  ;;  %v355_v58 = vmul.f32 %v3375_v61, %v300_v20  ;;  %v3521_v5 = vld [vmem:[#allocation7 + $0x1a8] sm:$0xff]   ;;  %v3523_v7 = vld [vmem:[#allocation7 + $0x160] sm:$0xff]   ;;  %v649_v51 = vunpack.c.h.bf16 %v3431_v48 }
  0xfd   : > { %4360 = vst [vmem:[#allocation22_spill] sm:$0xff] %v3478_v26  ;;  %4361 = vst [vmem:[#allocation23_spill] sm:$0xff] %v3480_v39  ;;  %v367_v59 = vmul.f32 %v3373_v60, %v312_v21  ;;  %v354_v18 = vmul.f32 %v3375_v61, %v299_v22  ;;  %1384 = vmatprep.mubr.bf16.mxu0 %v3490_v40  ;;  %v3511_v62 = vpack.c.bf16 %v3493_v41, %v3468_v19  ;;  %v313_v21 = vld [vmem:[%s3311_s14 + $0xb0] sm:$0xff] }
  0xfe   : > { %4364 = vst [vmem:[#allocation26_spill] sm:$0xff] %v3496_v42  ;;  %4365 = vst [vmem:[#allocation27_spill] sm:$0xff] %v3500_v43  ;;  %2388 = vmatpush3.bf16.msra.mxu0 %v3458_v6  ;;  %v578_v2 = vunpack.c.l.bf16 %v3500_v43  ;;  %v590_v3 = vunpack.c.h.bf16 %v3500_v43  ;;  %v366_v4 = vmul.f32 %v3373_v60, %v311_v17  ;;  %2410 = vmatpush3.bf16.msra.mxu1 %v3483_v13  ;;  %v3534_v17 = vld [vmem:[#allocation7 + $0x1e0] sm:$0xff]   ;;  %v637_v6 = vunpack.c.l.bf16 %v3431_v48  ;;  %v3633_v24 = vld [vmem:[#allocation7 + $0x110] sm:$0xff]  }
  0xff   : > { %4366 = vst [vmem:[#allocation28_spill] sm:$0xff] %v3514_v63  ;;  %2389 = vmatprep.subr.bf16.mxu0 %v3485_v14  ;;  %4367 = vst [vmem:[#allocation29_spill] sm:$0xff] %v3521_v5  ;;  %v3525_v8 = vpack.c.bf16 %v364_v54, %v352_v44  ;;  %v3527_v20 = vpack.c.bf16 %v367_v59, %v355_v58  ;;  %v356_v22 = vmul.f32 %v3375_v61, %v301_v53 }
 0x100   : > { %4368 = vst [vmem:[#allocation30_spill] sm:$0xff] %v3523_v7  ;;  %1425 = vmatprep.mubr.bf16.mxu1 %v3511_v62  ;;  %2411 = vmatprep.subr.bf16.mxu1 %v3496_v42  ;;  %v3537_v43 = vsub.f32 %v3445_v56, %v578_v2  ;;  %v3540_v14 = vsub.f32 %v3448_v57, %v590_v3 }
 0x101   : > { %4369 = vst [vmem:[#allocation31_spill] sm:$0xff] %v3525_v8  ;;  %4370 = vst [vmem:[#allocation32_spill] sm:$0xff] %v3527_v20  ;;  %v3542_v13 = vpack.c.bf16 %v366_v4, %v354_v18  ;;  %v580_v61 = vunpack.c.l.bf16 %v3525_v8  ;;  %v592_v53 = vunpack.c.h.bf16 %v3525_v8  ;;  %v583_v1 = vunpack.c.l.bf16 %v3527_v20  ;;  %v3561_v8 = vld [vmem:[#allocation7 + $0x1a0] sm:$0xff]  }
 0x102   : > { %v595_v42 = vunpack.c.h.bf16 %v3527_v20  ;;  %2390 = vmatpush3.bf16.msra.mxu0 %v3514_v63  ;;  %v3554_v56 = vpack.c.bf16 %v3540_v14, %v3537_v43  ;;  %v368_v3 = vmul.f32 %v3373_v60, %v313_v21  ;;  %2412 = vmatpush3.bf16.msra.mxu1 %v3521_v5  ;;  %v3563_v20 = vld [vmem:[#allocation7 + $0x158] sm:$0xff]   ;;  %v3587_v48 = vsub.f32 %v3417_v36, %v647_v23 }
 0x103   : > { %4371 = vst [vmem:[#allocation33_spill] sm:$0xff] %v3542_v13  ;;  %v582_v57 = vunpack.c.l.bf16 %v3542_v13  ;;  %v594_v2 = vunpack.c.h.bf16 %v3542_v13  ;;  %2391 = vmatprep.subr.bf16.mxu0 %v3523_v7  ;;  %v604_v63 = vsub.f32 %v352_v44, %v580_v61  ;;  %v616_v52 = vsub.f32 %v364_v54, %v592_v53  ;;  %2413 = vmatprep.subr.bf16.mxu1 %v3534_v17  ;;  %v3620_v61 = vld [vmem:[#allocation7 + $0x1d0] sm:$0xff]  }
 0x104   : > { %v3565_v50 = vsub.f32 %v355_v58, %v583_v1  ;;  %v3571_v13 = vsub.f32 %v367_v59, %v595_v42  ;;  %v3577_v7 = vpack.c.bf16 %v368_v3, %v356_v22  ;;  %v4373_v44 = vunpack.c.l.bf16 %v3427_v45  ;;  %4375 = vst [vmem:[#allocation36_spill] sm:$0xff] %v3587_v48  ;;  %v3593_v42 = vld [vmem:[#allocation7 + $0x118] sm:$0xff]   ;;  %v3824_v48 = vld [vmem:[#allocation7 + $0x240] sm:$0xff]  }
 0x105   : > { %v3573_v60 = vsub.f32 %v354_v18, %v582_v57  ;;  %v3575_v21 = vsub.f32 %v366_v4, %v594_v2  ;;  %v3579_v5 = vpack.c.bf16 %v616_v52, %v604_v63  ;;  %v3590_v54 = vsub.f32 %v3419_v37, %v637_v6  ;;  %v3607_v37 = vld [vmem:[#allocation7 + $0x198] sm:$0xff]   ;;  %v3609_v6 = vld [vmem:[#allocation7 + $0x150] sm:$0xff]   ;;  %v3657_v2 = vld [vmem:[#allocation7 + $0x1c8] sm:$0xff]   ;;  %4406 = vst [vmem:[#allocation67_spill] sm:$0xff] %v3824_v48 }
 0x106   : > { %4372 = vst [vmem:[#allocation34_spill] sm:$0xff] %v3577_v7  ;;  %v3584_v1 = vsub.f32 %v3415_v27, %v4373_v44  ;;  %2392 = vmatpush3.bf16.msra.mxu0 %v3550_v55  ;;  %v3597_v58 = vpack.c.bf16 %v3571_v13, %v3565_v50  ;;  %v584_v27 = vunpack.c.l.bf16 %v3577_v7  ;;  %v596_v36 = vunpack.c.h.bf16 %v3577_v7  ;;  %2414 = vmatpush3.bf16.msra.mxu1 %v3561_v8  ;;  %v3827_v7 = vld [vmem:[#allocation7 + $0x2c0] sm:$0xff]  }
 0x107   : > { %4376 = vst [vmem:[#allocation37_spill] sm:$0xff] %v3590_v54  ;;  %v3601_v45 = vpack.c.bf16 %v3575_v21, %v3573_v60  ;;  %2393 = vmatprep.subr.bf16.mxu0 %v3563_v20  ;;  %v3614_v59 = vsub.f32 %v3421_v38, %v649_v51  ;;  %v639_v4 = vunpack.c.l.bf16 %v3490_v40  ;;  %2415 = vmatprep.subr.bf16.mxu1 %v3569_v49  ;;  %v651_v44 = vunpack.c.h.bf16 %v3490_v40  ;;  %v3676_v38 = vld [vmem:[#allocation7 + $0x108] sm:$0xff]  }
 0x108   : > { %4374 = vst [vmem:[#allocation35_spill] sm:$0xff] %v3584_v1  ;;  %v608_v53 = vsub.f32 %v356_v22, %v584_v27  ;;  %v620_v57 = vsub.f32 %v368_v3, %v596_v36  ;;  %v641_v18 = vunpack.c.l.bf16 %v3511_v62  ;;  %v653_v23 = vunpack.c.h.bf16 %v3511_v62  ;;  %v3646_v62 = vld [vmem:[#allocation7 + $0x148] sm:$0xff]   ;;  %4387 = vst [vmem:[#allocation48_spill] sm:$0xff] %v3676_v38 }
 0x109   : > { %4377 = vst [vmem:[#allocation38_spill] sm:$0xff] %v3614_v59  ;;  %v3628_v51 = vsub.f32 %v3464_v9, %v639_v4  ;;  %v3638_v3 = vsub.f32 %v3466_v10, %v651_v44  ;;  %v638_v40 = vunpack.c.l.bf16 %v3554_v56  ;;  %v650_v27 = vunpack.c.h.bf16 %v3554_v56  ;;  %v3644_v9 = vld [vmem:[#allocation7 + $0x190] sm:$0xff]   ;;  %4380 = vst [vmem:[#allocation41_spill] sm:$0xff] %v3646_v62  ;;  %v3815_v54 = vld [vmem:[#allocation7 + $0x2c8] sm:$0xff]  }
 0x10a   : > { %2394 = vmatpush3.bf16.msra.mxu0 %v3593_v42  ;;  %v3635_v22 = vpack.c.bf16 %v620_v57, %v608_v53  ;;  %2416 = vmatpush3.bf16.msra.mxu1 %v3607_v37  ;;  %v3649_v36 = vsub.f32 %v3468_v19, %v641_v18  ;;  %v3652_v4 = vsub.f32 %v3493_v41, %v653_v23  ;;  %v640_v10 = vunpack.c.l.bf16 %v3579_v5  ;;  %v3818_v59 = vld [vmem:[#allocation7 + $0x208] sm:$0xff]  }
 0x10b   : > { %4378 = vst [vmem:[#allocation39_spill] sm:$0xff] %v3628_v51  ;;  %4379 = vst [vmem:[#allocation40_spill] sm:$0xff] %v3638_v3  ;;  %2395 = vmatprep.subr.bf16.mxu0 %v3609_v6  ;;  %v652_v44 = vunpack.c.h.bf16 %v3579_v5  ;;  %2417 = vmatprep.subr.bf16.mxu1 %v3620_v61  ;;  %v3662_v26 = vsub.f32 %v3537_v43, %v638_v40  ;;  %v3665_v19 = vsub.f32 %v3540_v14, %v650_v27  ;;  %v3699_v43 = vld [vmem:[#allocation7 + $0x1c0] sm:$0xff]   ;;  %v3810_v51 = vld [vmem:[#allocation7 + $0x290] sm:$0xff]  }
 0x10c   : > { %4381 = vst [vmem:[#allocation42_spill] sm:$0xff] %v3649_v36  ;;  %4382 = vst [vmem:[#allocation43_spill] sm:$0xff] %v3652_v4  ;;  %v643_v41 = vunpack.c.l.bf16 %v3597_v58  ;;  %v3670_v18 = vsub.f32 %v604_v63, %v640_v10  ;;  %v655_v25 = vunpack.c.h.bf16 %v3597_v58  ;;  %v642_v40 = vunpack.c.l.bf16 %v3601_v45  ;;  %v3689_v63 = vld [vmem:[#allocation7 + $0x140] sm:$0xff]   ;;  %v3803_v36 = vld [vmem:[#allocation7 + $0x2d0] sm:$0xff]  }
 0x10d   : > { %4383 = vst [vmem:[#allocation44_spill] sm:$0xff] %v3662_v26  ;;  %4384 = vst [vmem:[#allocation45_spill] sm:$0xff] %v3665_v19  ;;  %v3672_v39 = vsub.f32 %v616_v52, %v652_v44  ;;  %v654_v27 = vunpack.c.h.bf16 %v3601_v45  ;;  %v3687_v52 = vld [vmem:[#allocation7 + $0x188] sm:$0xff]   ;;  %v585_v23 = vunpack.c.l.bf16 %v3381_v0  ;;  %v597_v10 = vunpack.c.h.bf16 %v3381_v0  ;;  %v3806_v4 = vld [vmem:[#allocation7 + $0x210] sm:$0xff]  }
 0x10e   : > { %4385 = vst [vmem:[#allocation46_spill] sm:$0xff] %v3670_v18  ;;  %2396 = vmatpush3.bf16.msra.mxu0 %v3633_v24  ;;  %v3681_v14 = vsub.f32 %v3565_v50, %v643_v41  ;;  %2418 = vmatpush3.bf16.msra.mxu1 %v3644_v9  ;;  %v3694_v44 = vsub.f32 %v3571_v13, %v655_v25  ;;  %v644_v50 = vunpack.c.l.bf16 %v3635_v22  ;;  %v656_v41 = vunpack.c.h.bf16 %v3635_v22  ;;  %v3747_v25 = vld [vmem:[#allocation7 + $0x2f0] sm:$0xff]   ;;  %v3812_v3 = vld [vmem:[#allocation7 + $0x248] sm:$0xff]  }
 0x10f   : > { %4386 = vst [vmem:[#allocation47_spill] sm:$0xff] %v3672_v39  ;;  %2397 = vmatprep.subr.bf16.mxu0 %v3646_v62  ;;  %2419 = vmatprep.subr.bf16.mxu1 %v3657_v2  ;;  %v3703_v26 = vsub.f32 %v3573_v60, %v642_v40  ;;  %v3706_v19 = vsub.f32 %v3575_v21, %v654_v27  ;;  %v3716_v39 = vld [vmem:[#allocation7 + $0x100] sm:$0xff]   ;;  %v3724_v40 = vld [vmem:[#allocation7 + $0x278] sm:$0xff]   ;;  %4399 = vst [vmem:[#allocation60_spill] sm:$0xff] %v3803_v36 }
 0x110   : > { %4388 = vst [vmem:[#allocation49_spill] sm:$0xff] %v3681_v14  ;;  %4389 = vst [vmem:[#allocation50_spill] sm:$0xff] %v3694_v44  ;;  %v3711_v13 = vsub.f32 %v608_v53, %v644_v50  ;;  %v3713_v18 = vsub.f32 %v620_v57, %v656_v41  ;;  %v3722_v21 = vld [vmem:[#allocation7 + $0x180] sm:$0xff]   ;;  %v3729_v57 = vld [vmem:[#allocation7 + $0x2f8] sm:$0xff]   ;;  %v3732_v27 = vsub.f32 %v3361_v46, %v585_v23 }
 0x111   : > { %4390 = vst [vmem:[#allocation51_spill] sm:$0xff] %v3703_v26  ;;  %4391 = vst [vmem:[#allocation52_spill] sm:$0xff] %v3706_v19  ;;  %v3735_v50 = vsub.f32 %v3363_v47, %v597_v10  ;;  %v3738_v41 = vld [vmem:[#allocation7 + $0x238] sm:$0xff]   ;;  %v3745_v53 = vld [vmem:[#allocation7 + $0x270] sm:$0xff]  }
 0x112   : > { %4392 = vst [vmem:[#allocation53_spill] sm:$0xff] %v3711_v13  ;;  %4393 = vst [vmem:[#allocation54_spill] sm:$0xff] %v3713_v18  ;;  %2398 = vmatpush3.bf16.msra.mxu0 %v3676_v38  ;;  %2420 = vmatpush3.bf16.msra.mxu1 %v3687_v52  ;;  %v3742_v60 = vld [vmem:[#allocation7 + $0x2b8] sm:$0xff]   ;;  %v3756_v47 = vld [vmem:[#allocation7 + $0x230] sm:$0xff]  }
 0x113   : > { %2399 = vmatprep.subr.bf16.mxu0 %v3689_v63  ;;  %2421 = vmatprep.subr.bf16.mxu1 %v3699_v43  ;;  %4394 = vst [vmem:[#allocation55_spill] sm:$0xff] %v3732_v27  ;;  %4395 = vst [vmem:[#allocation56_spill] sm:$0xff] %v3735_v50  ;;  %v3752_v46 = vpack.c.bf16 %v3735_v50, %v3732_v27  ;;  %v3760_v23 = vld [vmem:[#allocation7 + $0x2b0] sm:$0xff]   ;;  %v3762_v10 = vld [vmem:[#allocation7 + $0x268] sm:$0xff]  }
 0x114   : > { %v3776_v13 = vld [vmem:[#allocation7 + $0x260] sm:$0xff]   ;;  %v3788_v14 = vld [vmem:[#allocation7 + $0x258] sm:$0xff]   ;;  %4400 = vst [vmem:[#allocation61_spill] sm:$0xff] %v3806_v4  ;;  %4401 = vst [vmem:[#allocation62_spill] sm:$0xff] %v3810_v51 }
 0x115   : > { %4396 = vst [vmem:[#allocation57_spill] sm:$0xff] %v3752_v46  ;;  %v3779_v18 = vld [vmem:[#allocation7 + $0x2e0] sm:$0xff]   ;;  %v3791_v44 = vld [vmem:[#allocation7 + $0x2d8] sm:$0xff]   ;;  %4402 = vst [vmem:[#allocation63_spill] sm:$0xff] %v3812_v3 }
 0x116   : > { %2400 = vmatpush3.bf16.msra.mxu0 %v3716_v39  ;;  %2422 = vmatpush3.bf16.msra.mxu1 %v3722_v21  ;;  %v3782_v26 = vld [vmem:[#allocation7 + $0x220] sm:$0xff]   ;;  %4397 = vst [vmem:[#allocation58_spill] sm:$0xff] %v3791_v44  ;;  %v3794_v50 = vld [vmem:[#allocation7 + $0x218] sm:$0xff]   ;;  %4403 = vst [vmem:[#allocation64_spill] sm:$0xff] %v3815_v54 }
 0x117   : > { %2429 = vmatprep.subr.bf16.mxu0 %v3724_v40  ;;  %2451 = vmatprep.subr.bf16.mxu1 %v3729_v57  ;;  %v3786_v19 = vld [vmem:[#allocation7 + $0x2a0] sm:$0xff]   ;;  %v3798_v27 = vld [vmem:[#allocation7 + $0x298] sm:$0xff]   ;;  %4404 = vst [vmem:[#allocation65_spill] sm:$0xff] %v3818_v59  ;;  %v3822_v1 = vld [vmem:[#allocation7 + $0x288] sm:$0xff]  }
 0x118   : > { %4398 = vst [vmem:[#allocation59_spill] sm:$0xff] %v3798_v27  ;;  %4405 = vst [vmem:[#allocation66_spill] sm:$0xff] %v3822_v1 }
 0x119   : > { %1385 = vmatmul.mubr.bf16.vlgmr.msra.gmra.mxu0 %v3554_v56  ;;  %1426 = vmatmul.mubr.bf16.vlgmr.msra.gmra.mxu1 %v3579_v5  ;;  %v3766_v56 = vld [vmem:[#allocation7 + $0x2e8] sm:$0xff]   ;;  %4407 = vst [vmem:[#allocation68_spill] sm:$0xff] %v3827_v7 }
 0x11a   : > { %2430 = vmatpush3.bf16.msra.mxu0 %v3738_v41  ;;  %1466 = vmatprep.mubr.bf16.mxu0 %v3597_v58  ;;  %v3770_v5 = vld [vmem:[#allocation7 + $0x228] sm:$0xff]  }
 0x11b   : > { %2452 = vmatpush3.bf16.msra.mxu1 %v3742_v60  ;;  %2431 = vmatprep.subr.bf16.mxu0 %v3745_v53  ;;  %v3774_v58 = vld [vmem:[#allocation7 + $0x2a8] sm:$0xff]  }
 0x11c   : > { %2453 = vmatprep.subr.bf16.mxu1 %v3747_v25  ;;  %1507 = vmatprep.mubr.bf16.mxu1 %v3752_v46  ;;  %v3800_v46 = vld [vmem:[#allocation7 + $0x250] sm:$0xff]  }
 0x11e   : > { %2432 = vmatpush3.bf16.msra.mxu0 %v3756_v47 }
 0x11f   : > { %2454 = vmatpush3.bf16.msra.mxu1 %v3760_v23  ;;  %2433 = vmatprep.subr.bf16.mxu0 %v3762_v10 }
 0x120   : > { %2455 = vmatprep.subr.bf16.mxu1 %v3766_v56 }
 0x122   : > { %2434 = vmatpush3.bf16.msra.mxu0 %v3770_v5 }
 0x123   : > { %2456 = vmatpush3.bf16.msra.mxu1 %v3774_v58  ;;  %2435 = vmatprep.subr.bf16.mxu0 %v3776_v13 }
 0x124   : > { %2457 = vmatprep.subr.bf16.mxu1 %v3779_v18 }
 0x126   : > { %2436 = vmatpush3.bf16.msra.mxu0 %v3782_v26 }
 0x127   : > { %2458 = vmatpush3.bf16.msra.mxu1 %v3786_v19  ;;  %2437 = vmatprep.subr.bf16.mxu0 %v3788_v14 }
 0x128   : > { %2459 = vmatprep.subr.bf16.mxu1 %v3791_v44 }
 0x12a   : > { %2438 = vmatpush3.bf16.msra.mxu0 %v3794_v50 }
 0x12b   : > { %2460 = vmatpush3.bf16.msra.mxu1 %v3798_v27  ;;  %2439 = vmatprep.subr.bf16.mxu0 %v3800_v46 }
 0x12c   : > { %2461 = vmatprep.subr.bf16.mxu1 %v3803_v36  ;;  %v3830_v36 = vld [vmem:[#allocation7 + $0x200] sm:$0xff]  }
 0x12d   : > { %4408 = vst [vmem:[#allocation69_spill] sm:$0xff] %v3830_v36 }
 0x12e   : > { %2440 = vmatpush3.bf16.msra.mxu0 %v3806_v4  ;;  %v3834_v4 = vld [vmem:[#allocation7 + $0x280] sm:$0xff]  }
 0x12f   : > { %2462 = vmatpush3.bf16.msra.mxu1 %v3810_v51  ;;  %2441 = vmatprep.subr.bf16.mxu0 %v3812_v3  ;;  %4409 = vst [vmem:[#allocation70_spill] sm:$0xff] %v3834_v4  ;;  %v3839_v3 = vld [vmem:[#allocation7 + $0x78] sm:$0xff]  }
 0x130   : > { %2463 = vmatprep.subr.bf16.mxu1 %v3815_v54  ;;  %4410 = vst [vmem:[#allocation71_spill] sm:$0xff] %v3839_v3  ;;  %v3842_v54 = vld [vmem:[#allocation7 + $0xf8] sm:$0xff]  }
 0x131   : > { %4411 = vst [vmem:[#allocation72_spill] sm:$0xff] %v3842_v54 }
 0x132   : > { %2442 = vmatpush3.bf16.msra.mxu0 %v3818_v59 }
 0x133   : > { %2464 = vmatpush3.bf16.msra.mxu1 %v3822_v1  ;;  %2443 = vmatprep.subr.bf16.mxu0 %v3824_v48  ;;  %v3847_v48 = vld [vmem:[#allocation7 + $0x38] sm:$0xff]  }
 0x134   : > { %2465 = vmatprep.subr.bf16.mxu1 %v3827_v7 }
 0x136   : > { %2444 = vmatpush3.bf16.msra.mxu0 %v3830_v36  ;;  %v3851_v36 = vld [vmem:[#allocation7 + $0xb8] sm:$0xff]  }
 0x137   : > { %2466 = vmatpush3.bf16.msra.mxu1 %v3834_v4  ;;  %2473 = vmatprep.subr.bf16.mxu0 %v3839_v3  ;;  %v3855_v3 = vld [vmem:[#allocation7 + $0x70] sm:$0xff]  }
 0x138   : > { %2495 = vmatprep.subr.bf16.mxu1 %v3842_v54  ;;  %4412 = vst [vmem:[#allocation73_spill] sm:$0xff] %v3855_v3  ;;  %v3858_v54 = vld [vmem:[#allocation7 + $0xf0] sm:$0xff]  }
 0x139   : > { %1467 = vmatmul.mubr.bf16.vlgmr.msra.gmra.mxu0 %v3601_v45  ;;  %4413 = vst [vmem:[#allocation74_spill] sm:$0xff] %v3858_v54  ;;  %v3861_v45 = vld [vmem:[#allocation7 + $0x30] sm:$0xff]  }
 0x13a   : > { %1508 = vmatmul.mubr.bf16.vlgmr.msra.gmra.mxu1 %v3635_v22  ;;  %2474 = vmatpush3.bf16.msra.mxu0 %v3847_v48  ;;  %4414 = vst [vmem:[#allocation75_spill] sm:$0xff] %v3861_v45  ;;  %v3864_v22 = vld [vmem:[#allocation7 + $0xb0] sm:$0xff]  }
 0x13b   : > { %1548 = vmatprep.mubr.bf16.mxu0 %v3393_v11  ;;  %2496 = vmatpush3.bf16.msra.mxu1 %v3851_v36  ;;  %4415 = vst [vmem:[#allocation76_spill] sm:$0xff] %v3864_v22  ;;  %v3867_v11 = vld [vmem:[#allocation7 + $0x68] sm:$0xff]  }
 0x13c   : > { %1589 = vmatprep.mubr.bf16.mxu1 %v3395_v12  ;;  %2475 = vmatprep.subr.bf16.mxu0 %v3855_v3  ;;  %4416 = vst [vmem:[#allocation77_spill] sm:$0xff] %v3867_v11  ;;  %v3870_v12 = vld [vmem:[#allocation7 + $0xe8] sm:$0xff]  }
 0x13d   : > { %2497 = vmatprep.subr.bf16.mxu1 %v3858_v54  ;;  %4417 = vst [vmem:[#allocation78_spill] sm:$0xff] %v3870_v12  ;;  %v3873_v3 = vld [vmem:[#allocation7 + $0x28] sm:$0xff]  }
 0x13e   : > { %2476 = vmatpush3.bf16.msra.mxu0 %v3861_v45  ;;  %4418 = vst [vmem:[#allocation79_spill] sm:$0xff] %v3873_v3  ;;  %v3876_v54 = vld [vmem:[#allocation7 + $0xa8] sm:$0xff]   ;;  %v3879_v45 = vld [vmem:[#allocation7 + $0x60] sm:$0xff]  }
 0x13f   : > { %2498 = vmatpush3.bf16.msra.mxu1 %v3864_v22  ;;  %2477 = vmatprep.subr.bf16.mxu0 %v3867_v11  ;;  %4419 = vst [vmem:[#allocation80_spill] sm:$0xff] %v3876_v54  ;;  %4420 = vst [vmem:[#allocation81_spill] sm:$0xff] %v3879_v45  ;;  %v3882_v22 = vld [vmem:[#allocation7 + $0xe0] sm:$0xff]  }
 0x140   : > { %2499 = vmatprep.subr.bf16.mxu1 %v3870_v12  ;;  %4421 = vst [vmem:[#allocation82_spill] sm:$0xff] %v3882_v22  ;;  %v3885_v11 = vld [vmem:[#allocation7 + $0x20] sm:$0xff]  }
 0x141   : > { %4422 = vst [vmem:[#allocation83_spill] sm:$0xff] %v3885_v11  ;;  %v3888_v12 = vld [vmem:[#allocation7 + $0xa0] sm:$0xff]  }
 0x142   : > { %2478 = vmatpush3.bf16.msra.mxu0 %v3873_v3  ;;  %4423 = vst [vmem:[#allocation84_spill] sm:$0xff] %v3888_v12  ;;  %v3891_v3 = vld [vmem:[#allocation7 + $0x58] sm:$0xff]  }
 0x143   : > { %2500 = vmatpush3.bf16.msra.mxu1 %v3876_v54  ;;  %2479 = vmatprep.subr.bf16.mxu0 %v3879_v45  ;;  %4424 = vst [vmem:[#allocation85_spill] sm:$0xff] %v3891_v3  ;;  %v3894_v54 = vld [vmem:[#allocation7 + $0xd8] sm:$0xff]  }
 0x144   : > { %2501 = vmatprep.subr.bf16.mxu1 %v3882_v22  ;;  %4425 = vst [vmem:[#allocation86_spill] sm:$0xff] %v3894_v54  ;;  %v3897_v45 = vld [vmem:[#allocation7 + $0x18] sm:$0xff]  }
 0x145   : > { %4426 = vst [vmem:[#allocation87_spill] sm:$0xff] %v3897_v45  ;;  %v3900_v22 = vld [vmem:[#allocation7 + $0x98] sm:$0xff]  }
 0x146   : > { %2480 = vmatpush3.bf16.msra.mxu0 %v3885_v11  ;;  %4427 = vst [vmem:[#allocation88_spill] sm:$0xff] %v3900_v22  ;;  %v3903_v11 = vld [vmem:[#allocation7 + $0x50] sm:$0xff]  }
 0x147   : > { %2502 = vmatpush3.bf16.msra.mxu1 %v3888_v12  ;;  %2481 = vmatprep.subr.bf16.mxu0 %v3891_v3  ;;  %v3906_v12 = vld [vmem:[#allocation7 + $0xd0] sm:$0xff]  }
 0x148   : > { %2503 = vmatprep.subr.bf16.mxu1 %v3894_v54  ;;  %v3909_v3 = vld [vmem:[#allocation7 + $0x10] sm:$0xff]  }
 0x149   : > { %v3912_v54 = vld [vmem:[#allocation7 + $0x90] sm:$0xff]  }
 0x14a   : > { %2482 = vmatpush3.bf16.msra.mxu0 %v3897_v45  ;;  %v3915_v45 = vld [vmem:[#allocation7 + $0x48] sm:$0xff]  }
 0x14b   : > { %2504 = vmatpush3.bf16.msra.mxu1 %v3900_v22  ;;  %2483 = vmatprep.subr.bf16.mxu0 %v3903_v11  ;;  %v3918_v22 = vld [vmem:[#allocation7 + $0xc8] sm:$0xff]  }
 0x14c   : > { %2505 = vmatprep.subr.bf16.mxu1 %v3906_v12  ;;  %4428 = vst [vmem:[#allocation89_spill] sm:$0xff] %v3918_v22 }
 0x14e   : > { %2484 = vmatpush3.bf16.msra.mxu0 %v3909_v3 }
 0x14f   : > { %2506 = vmatpush3.bf16.msra.mxu1 %v3912_v54  ;;  %2485 = vmatprep.subr.bf16.mxu0 %v3915_v45 }
 0x150   : > { %2507 = vmatprep.subr.bf16.mxu1 %v3918_v22  ;;  %v4429_v22 = vld [vmem:[#allocation13_spill] sm:$0xff] }
 0x152   : > { %2486 = vmatpush3.bf16.msra.mxu0 %v3331_v28  ;;  %v4430_v28 = vld [vmem:[#allocation15_spill] sm:$0xff] }
 0x153   : > { %2508 = vmatpush3.bf16.msra.mxu1 %v3333_v29  ;;  %2487 = vmatprep.subr.bf16.mxu0 %v3335_v30  ;;  %v4431_v29 = vld [vmem:[#allocation14_spill] sm:$0xff]  ;;  %v4432_v30 = vld [vmem:[#allocation16_spill] sm:$0xff] }
 0x154   : > { %2509 = vmatprep.subr.bf16.mxu1 %v3339_v31  ;;  %v4433_v31 = vld [vmem:[#allocation17_spill] sm:$0xff] }
 0x156   : > { %2488 = vmatpush3.bf16.msra.mxu0 %v3342_v32  ;;  %v4434_v32 = vld [vmem:[#allocation18_spill] sm:$0xff] }
 0x157   : > { %2510 = vmatpush3.bf16.msra.mxu1 %v3345_v33  ;;  %2517 = vmatprep.subr.bf16.mxu0 %v3349_v34  ;;  %v4435_v33 = vld [vmem:[#allocation19_spill] sm:$0xff]  ;;  %v4436_v34 = vld [vmem:[#allocation24_spill] sm:$0xff] }
 0x158   : > { %2539 = vmatprep.subr.bf16.mxu1 %v3351_v35  ;;  %v4437_v35 = vld [vmem:[#allocation25_spill] sm:$0xff] }
 0x159   : > { %1549 = vmatmul.mubr.bf16.vlgmr.msra.gmra.mxu0 %v3399_v15  ;;  %v4438_v15 = vld [vmem:[#allocation26_spill] sm:$0xff] }
 0x15a   : > { %1590 = vmatmul.mubr.bf16.vlgmr.msra.gmra.mxu1 %v3401_v16  ;;  %2518 = vmatpush3.bf16.msra.mxu0 %v4429_v22  ;;  %v4439_v16 = vld [vmem:[#allocation28_spill] sm:$0xff]  ;;  %v4440_v22 = vld [vmem:[#allocation29_spill] sm:$0xff] }
 0x15b   : > { %1630 = vmatprep.mubr.bf16.mxu0 %v4430_v28  ;;  %2540 = vmatpush3.bf16.msra.mxu1 %v4431_v29  ;;  %v4441_v28 = vld [vmem:[#allocation30_spill] sm:$0xff] }
 0x15c   : > { %1671 = vmatprep.mubr.bf16.mxu1 %v4432_v30  ;;  %2519 = vmatprep.subr.bf16.mxu0 %v4433_v31  ;;  %v4442_v30 = vld [vmem:[#allocation27_spill] sm:$0xff] }
 0x15d   : > { %2541 = vmatprep.subr.bf16.mxu1 %v4434_v32 }
 0x15e   : > { %2520 = vmatpush3.bf16.msra.mxu0 %v4435_v33 }
 0x15f   : > { %2542 = vmatpush3.bf16.msra.mxu1 %v4436_v34  ;;  %2521 = vmatprep.subr.bf16.mxu0 %v4437_v35 }
 0x160   : > { %2543 = vmatprep.subr.bf16.mxu1 %v4438_v15 }
 0x162   : > { %2522 = vmatpush3.bf16.msra.mxu0 %v4439_v16 }
 0x163   : > { %2544 = vmatpush3.bf16.msra.mxu1 %v4440_v22  ;;  %2523 = vmatprep.subr.bf16.mxu0 %v4441_v28 }
 0x164   : > { %2545 = vmatprep.subr.bf16.mxu1 %v3534_v17 }
 0x166   : > { %2524 = vmatpush3.bf16.msra.mxu0 %v3550_v55 }
 0x167   : > { %2546 = vmatpush3.bf16.msra.mxu1 %v3561_v8  ;;  %2525 = vmatprep.subr.bf16.mxu0 %v3563_v20 }
 0x168   : > { %2547 = vmatprep.subr.bf16.mxu1 %v3569_v49 }
 0x16a   : > { %2526 = vmatpush3.bf16.msra.mxu0 %v3593_v42 }
 0x16b   : > { %2548 = vmatpush3.bf16.msra.mxu1 %v3607_v37  ;;  %2527 = vmatprep.subr.bf16.mxu0 %v3609_v6 }
 0x16c   : > { %2549 = vmatprep.subr.bf16.mxu1 %v3620_v61 }
 0x16e   : > { %2528 = vmatpush3.bf16.msra.mxu0 %v3633_v24 }
 0x16f   : > { %2550 = vmatpush3.bf16.msra.mxu1 %v3644_v9  ;;  %2529 = vmatprep.subr.bf16.mxu0 %v3646_v62  ;;  %v4443_v62 = vld [vmem:[#allocation31_spill] sm:$0xff] }
 0x170   : > { %2551 = vmatprep.subr.bf16.mxu1 %v3657_v2 }
 0x172   : > { %2530 = vmatpush3.bf16.msra.mxu0 %v3676_v38  ;;  %v4444_v38 = vld [vmem:[#allocation32_spill] sm:$0xff] }
 0x173   : > { %2552 = vmatpush3.bf16.msra.mxu1 %v3687_v52  ;;  %2531 = vmatprep.subr.bf16.mxu0 %v3689_v63 }
 0x174   : > { %2553 = vmatprep.subr.bf16.mxu1 %v3699_v43 }
 0x176   : > { %2532 = vmatpush3.bf16.msra.mxu0 %v3716_v39 }
 0x177   : > { %2554 = vmatpush3.bf16.msra.mxu1 %v3722_v21  ;;  %2561 = vmatprep.subr.bf16.mxu0 %v3724_v40 }
 0x178   : > { %2583 = vmatprep.subr.bf16.mxu1 %v3729_v57 }
 0x179   : > { %1631 = vmatmul.mubr.bf16.vlgmr.msra.gmra.mxu0 %v4442_v30  ;;  %v4448_v30 = vld [vmem:[#allocation64_spill] sm:$0xff] }
 0x17a   : > { %1672 = vmatmul.mubr.bf16.vlgmr.msra.gmra.mxu1 %v4443_v62  ;;  %2562 = vmatpush3.bf16.msra.mxu0 %v3738_v41  ;;  %v4447_v62 = vld [vmem:[#allocation63_spill] sm:$0xff] }
 0x17b   : > { %1712 = vmatprep.mubr.bf16.mxu0 %v4444_v38  ;;  %2584 = vmatpush3.bf16.msra.mxu1 %v3742_v60  ;;  %v4446_v38 = vld [vmem:[#allocation61_spill] sm:$0xff] }
 0x17c   : > { %2563 = vmatprep.subr.bf16.mxu0 %v3745_v53  ;;  %2585 = vmatprep.subr.bf16.mxu1 %v3747_v25 }
 0x17d   : > { %1753 = vmatprep.mubr.bf16.mxu1 %v3381_v0  ;;  %v4445_v0 = vld [vmem:[#allocation60_spill] sm:$0xff] }
 0x17e   : > { %2564 = vmatpush3.bf16.msra.mxu0 %v3756_v47 }
 0x17f   : > { %2586 = vmatpush3.bf16.msra.mxu1 %v3760_v23  ;;  %2565 = vmatprep.subr.bf16.mxu0 %v3762_v10 }
 0x180   : > { %2587 = vmatprep.subr.bf16.mxu1 %v3766_v56 }
 0x182   : > { %2566 = vmatpush3.bf16.msra.mxu0 %v3770_v5 }
 0x183   : > { %2588 = vmatpush3.bf16.msra.mxu1 %v3774_v58  ;;  %2567 = vmatprep.subr.bf16.mxu0 %v3776_v13 }
 0x184   : > { %2589 = vmatprep.subr.bf16.mxu1 %v3779_v18 }
 0x186   : > { %2568 = vmatpush3.bf16.msra.mxu0 %v3782_v26 }
 0x187   : > { %2590 = vmatpush3.bf16.msra.mxu1 %v3786_v19  ;;  %2569 = vmatprep.subr.bf16.mxu0 %v3788_v14 }
 0x188   : > { %2591 = vmatprep.subr.bf16.mxu1 %v3791_v44  ;;  %v4449_v44 = vld [vmem:[#allocation67_spill] sm:$0xff] }
 0x18a   : > { %2570 = vmatpush3.bf16.msra.mxu0 %v3794_v50 }
 0x18b   : > { %2592 = vmatpush3.bf16.msra.mxu1 %v3798_v27  ;;  %2571 = vmatprep.subr.bf16.mxu0 %v3800_v46  ;;  %v4450_v27 = vld [vmem:[#allocation69_spill] sm:$0xff] }
 0x18c   : > { %2593 = vmatprep.subr.bf16.mxu1 %v4445_v0  ;;  %v4451_v0 = vld [vmem:[#allocation71_spill] sm:$0xff] }
 0x18e   : > { %2572 = vmatpush3.bf16.msra.mxu0 %v4446_v38  ;;  %v4452_v38 = vld [vmem:[#allocation72_spill] sm:$0xff] }
 0x18f   : > { %2594 = vmatpush3.bf16.msra.mxu1 %v3810_v51  ;;  %2573 = vmatprep.subr.bf16.mxu0 %v4447_v62  ;;  %v4453_v51 = vld [vmem:[#allocation33_spill] sm:$0xff]  ;;  %v4454_v62 = vld [vmem:[#allocation34_spill] sm:$0xff] }
 0x190   : > { %2595 = vmatprep.subr.bf16.mxu1 %v4448_v30 }
 0x192   : > { %2574 = vmatpush3.bf16.msra.mxu0 %v3818_v59  ;;  %v4455_v59 = vld [vmem:[#allocation36_spill] sm:$0xff] }
 0x193   : > { %2596 = vmatpush3.bf16.msra.mxu1 %v3822_v1  ;;  %2575 = vmatprep.subr.bf16.mxu0 %v4449_v44  ;;  %v4456_v1 = vld [vmem:[#allocation35_spill] sm:$0xff] }
 0x194   : > { %2597 = vmatprep.subr.bf16.mxu1 %v3827_v7  ;;  %v4457_v30 = vpack.c.bf16 %v4455_v59, %v4456_v1  ;;  %v4458_v7 = vld [vmem:[#allocation38_spill] sm:$0xff]  ;;  %v4467_v1 = vld [vmem:[#allocation79_spill] sm:$0xff]  ;;  %v4468_v59 = vld [vmem:[#allocation80_spill] sm:$0xff] }
 0x196   : > { %2576 = vmatpush3.bf16.msra.mxu0 %v4450_v27  ;;  %v4459_v27 = vld [vmem:[#allocation37_spill] sm:$0xff] }
 0x197   : > { %2598 = vmatpush3.bf16.msra.mxu1 %v3834_v4  ;;  %2605 = vmatprep.subr.bf16.mxu0 %v4451_v0  ;;  %v4460_v44 = vpack.c.bf16 %v4458_v7, %v4459_v27  ;;  %v4461_v4 = vld [vmem:[#allocation73_spill] sm:$0xff]  ;;  %v4462_v0 = vld [vmem:[#allocation74_spill] sm:$0xff] }
 0x198   : > { %2627 = vmatprep.subr.bf16.mxu1 %v4452_v38  ;;  %v4463_v38 = vld [vmem:[#allocation75_spill] sm:$0xff]  ;;  %v4470_v7 = vld [vmem:[#allocation82_spill] sm:$0xff]  ;;  %v4473_v27 = vld [vmem:[#allocation85_spill] sm:$0xff] }
 0x199   : > { %1713 = vmatmul.mubr.bf16.vlgmr.msra.gmra.mxu0 %v4453_v51  ;;  %v4464_v51 = vld [vmem:[#allocation76_spill] sm:$0xff] }
 0x19a   : > { %1754 = vmatmul.mubr.bf16.vlgmr.msra.gmra.mxu1 %v4454_v62  ;;  %2606 = vmatpush3.bf16.msra.mxu0 %v3847_v48  ;;  %v4465_v62 = vld [vmem:[#allocation77_spill] sm:$0xff]  ;;  %v4466_v48 = vld [vmem:[#allocation78_spill] sm:$0xff] }
 0x19b   : > { %1794 = vmatprep.mubr.bf16.mxu0 %v4457_v30  ;;  %2628 = vmatpush3.bf16.msra.mxu1 %v3851_v36  ;;  %v4469_v36 = vld [vmem:[#allocation81_spill] sm:$0xff]  ;;  %v4474_v30 = vld [vmem:[#allocation86_spill] sm:$0xff] }
 0x19c   : > { %1835 = vmatprep.mubr.bf16.mxu1 %v4460_v44  ;;  %2607 = vmatprep.subr.bf16.mxu0 %v4461_v4  ;;  %v4471_v44 = vld [vmem:[#allocation83_spill] sm:$0xff]  ;;  %v4472_v4 = vld [vmem:[#allocation84_spill] sm:$0xff] }
 0x19d   : > { %2629 = vmatprep.subr.bf16.mxu1 %v4462_v0  ;;  %v4475_v0 = vld [vmem:[#allocation87_spill] sm:$0xff] }
 0x19e   : > { %2608 = vmatpush3.bf16.msra.mxu0 %v4463_v38  ;;  %v4476_v38 = vld [vmem:[#allocation88_spill] sm:$0xff] }
 0x19f   : > { %2630 = vmatpush3.bf16.msra.mxu1 %v4464_v51  ;;  %2609 = vmatprep.subr.bf16.mxu0 %v4465_v62  ;;  %v4477_v51 = vld [vmem:[#allocation89_spill] sm:$0xff]  ;;  %v2935_v62 = vld [vmem:[#allocation7 + $0x8] sm:$0xff]  }
 0x1a0   : > { %2631 = vmatprep.subr.bf16.mxu1 %v4466_v48  ;;  %v2936_v48 = vld [vmem:[#allocation7 + $0x88] sm:$0xff]  }
 0x1a2   : > { %2610 = vmatpush3.bf16.msra.mxu0 %v4467_v1  ;;  %v2937_v1 = vld [vmem:[#allocation7 + $0x40] sm:$0xff]  }
 0x1a3   : > { %2632 = vmatpush3.bf16.msra.mxu1 %v4468_v59  ;;  %2611 = vmatprep.subr.bf16.mxu0 %v4469_v36  ;;  %v2938_v59 = vld [vmem:[#allocation7 + $0xc0] sm:$0xff]  }
 0x1a4   : > { %2633 = vmatprep.subr.bf16.mxu1 %v4470_v7  ;;  %v2939_v36 = vld [vmem:[#allocation7] sm:$0xff]  }
 0x1a6   : > { %2612 = vmatpush3.bf16.msra.mxu0 %v4471_v44  ;;  %v4481_v44 = vld [vmem:[#allocation23_spill] sm:$0xff] }
 0x1a7   : > { %2634 = vmatpush3.bf16.msra.mxu1 %v4472_v4  ;;  %2613 = vmatprep.subr.bf16.mxu0 %v4473_v27  ;;  %v4482_v4 = vld [vmem:[#allocation22_spill] sm:$0xff] }
 0x1a8   : > { %2635 = vmatprep.subr.bf16.mxu1 %v4474_v30  ;;  %v4483_v27 = vpack.c.bf16 %v4481_v44, %v4482_v4  ;;  %v4484_v30 = vld [vmem:[#allocation13_spill] sm:$0xff] }
 0x1aa   : > { %2614 = vmatpush3.bf16.msra.mxu0 %v4475_v0  ;;  %v4485_v0 = vld [vmem:[#allocation40_spill] sm:$0xff] }
 0x1ab   : > { %2636 = vmatpush3.bf16.msra.mxu1 %v4476_v38  ;;  %2615 = vmatprep.subr.bf16.mxu0 %v3903_v11  ;;  %v2940_v11 = vld [vmem:[#allocation7 + $0x80] sm:$0xff]   ;;  %v4486_v38 = vld [vmem:[#allocation39_spill] sm:$0xff] }
 0x1ac   : > { %2637 = vmatprep.subr.bf16.mxu1 %v3906_v12  ;;  %v2941_v12 = vld [vmem:[#allocation7 + $0x178] sm:$0xff]  }
 0x1ae   : > { %2616 = vmatpush3.bf16.msra.mxu0 %v3909_v3  ;;  %v2942_v3 = vld [vmem:[#allocation7 + $0x1f8] sm:$0xff]  }
 0x1af   : > { %2638 = vmatpush3.bf16.msra.mxu1 %v3912_v54  ;;  %2617 = vmatprep.subr.bf16.mxu0 %v3915_v45  ;;  %v4478_v54 = vld [vmem:[#allocation21_spill] sm:$0xff]  ;;  %v4479_v45 = vld [vmem:[#allocation20_spill] sm:$0xff] }
 0x1b0   : > { %2639 = vmatprep.subr.bf16.mxu1 %v4477_v51  ;;  %v4480_v7 = vpack.c.bf16 %v4478_v54, %v4479_v45  ;;  %v4487_v51 = vpack.c.bf16 %v4485_v0, %v4486_v38 }
 0x1b2   : > { %2618 = vmatpush3.bf16.msra.mxu0 %v2935_v62  ;;  %v4488_v62 = vld [vmem:[#allocation43_spill] sm:$0xff] }
 0x1b3   : > { %2640 = vmatpush3.bf16.msra.mxu1 %v2936_v48  ;;  %2619 = vmatprep.subr.bf16.mxu0 %v2937_v1  ;;  %v4489_v48 = vld [vmem:[#allocation42_spill] sm:$0xff] }
 0x1b4   : > { %2641 = vmatprep.subr.bf16.mxu1 %v2938_v59  ;;  %v4490_v1 = vpack.c.bf16 %v4488_v62, %v4489_v48 }
 0x1b6   : > { %2620 = vmatpush3.bf16.msra.mxu0 %v2939_v36 }
 0x1b7   : > { %2642 = vmatpush3.bf16.msra.mxu1 %v2940_v11  ;;  %2649 = vmatprep.subr.bf16.mxu0 %v2941_v12 }
 0x1b8   : > { %2671 = vmatprep.subr.bf16.mxu1 %v2942_v3 }
 0x1b9   : > { %1795 = vmatmul.mubr.bf16.vlgmr.msra.gmra.mxu0 %v4480_v7 }
 0x1ba   : > { %1836 = vmatmul.mubr.bf16.vlgmr.msra.gmra.mxu1 %v4483_v27  ;;  %2650 = vmatpush3.bf16.msra.mxu0 %v4484_v30 }
 0x1bb   : > { %1876 = vmatprep.mubr.bf16.mxu0 %v4487_v51  ;;  %2672 = vmatpush3.bf16.msra.mxu1 %v4431_v29  ;;  %v4502_v29 = vld [vmem:[#allocation50_spill] sm:$0xff] }
 0x1bc   : > { %1917 = vmatprep.mubr.bf16.mxu1 %v4490_v1  ;;  %2651 = vmatprep.subr.bf16.mxu0 %v4433_v31  ;;  %v4503_v31 = vld [vmem:[#allocation49_spill] sm:$0xff] }
 0x1bd   : > { %2673 = vmatprep.subr.bf16.mxu1 %v4434_v32  ;;  %v2379_v32 = vpop.f32.mrf.mxu1 }
 0x1be   : > { %2652 = vmatpush3.bf16.msra.mxu0 %v4435_v33 }
 0x1bf   : > { %2674 = vmatpush3.bf16.msra.mxu1 %v4436_v34  ;;  %2653 = vmatprep.subr.bf16.mxu0 %v4437_v35  ;;  %v2380_v34 = vpop.f32.mrf.mxu1 }
 0x1c0   : > { %2675 = vmatprep.subr.bf16.mxu1 %v4438_v15 }
 0x1c1   : > { %v2382_v15 = vpop.f32.mrf.mxu1 }
 0x1c2   : > { %2654 = vmatpush3.bf16.msra.mxu0 %v4439_v16 }
 0x1c3   : > { %2676 = vmatpush3.bf16.msra.mxu1 %v4440_v22  ;;  %2655 = vmatprep.subr.bf16.mxu0 %v4441_v28  ;;  %v4500_v22 = vld [vmem:[#allocation46_spill] sm:$0xff]  ;;  %v2383_v59 = vpop.f32.mrf.mxu1 }
 0x1c4   : > { %2677 = vmatprep.subr.bf16.mxu1 %v3534_v17  ;;  %v4491_v17 = vld [vmem:[#allocation41_spill] sm:$0xff] }
 0x1c6   : > { %2656 = vmatpush3.bf16.msra.mxu0 %v3550_v55  ;;  %v4492_v55 = vld [vmem:[#allocation57_spill] sm:$0xff] }
 0x1c7   : > { %2678 = vmatpush3.bf16.msra.mxu1 %v3561_v8  ;;  %2657 = vmatprep.subr.bf16.mxu0 %v3563_v20  ;;  %v645_v8 = vunpack.c.l.bf16 %v4492_v55  ;;  %v4493_v20 = vld [vmem:[#allocation48_spill] sm:$0xff] }
 0x1c8   : > { %2679 = vmatprep.subr.bf16.mxu1 %v3569_v49  ;;  %v657_v49 = vunpack.c.h.bf16 %v4492_v55 }
 0x1ca   : > { %2658 = vmatpush3.bf16.msra.mxu0 %v3593_v42  ;;  %v4494_v42 = vld [vmem:[#allocation55_spill] sm:$0xff] }
 0x1cb   : > { %2680 = vmatpush3.bf16.msra.mxu1 %v3607_v37  ;;  %2659 = vmatprep.subr.bf16.mxu0 %v3609_v6  ;;  %v4495_v37 = vld [vmem:[#allocation56_spill] sm:$0xff] }
 0x1cc   : > { %2681 = vmatprep.subr.bf16.mxu1 %v3620_v61  ;;  %v681_v6 = vsub.f32 %v4495_v37, %v657_v49  ;;  %v4496_v61 = vld [vmem:[#allocation45_spill] sm:$0xff] }
 0x1ce   : > { %2660 = vmatpush3.bf16.msra.mxu0 %v3633_v24  ;;  %v669_v24 = vsub.f32 %v4494_v42, %v645_v8 }
 0x1cf   : > { %2682 = vmatpush3.bf16.msra.mxu1 %v3644_v9  ;;  %2661 = vmatprep.subr.bf16.mxu0 %v4491_v17 }
 0x1d0   : > { %2683 = vmatprep.subr.bf16.mxu1 %v3657_v2  ;;  %v4497_v2 = vld [vmem:[#allocation44_spill] sm:$0xff] }
 0x1d1   : > { %v4498_v9 = vpack.c.bf16 %v4496_v61, %v4497_v2 }
 0x1d2   : > { %2662 = vmatpush3.bf16.msra.mxu0 %v4493_v20 }
 0x1d3   : > { %2684 = vmatpush3.bf16.msra.mxu1 %v3687_v52  ;;  %2663 = vmatprep.subr.bf16.mxu0 %v3689_v63  ;;  %v693_v52 = vpack.c.bf16 %v681_v6, %v669_v24  ;;  %v4499_v63 = vld [vmem:[#allocation47_spill] sm:$0xff] }
 0x1d4   : > { %2685 = vmatprep.subr.bf16.mxu1 %v3699_v43  ;;  %v4501_v43 = vpack.c.bf16 %v4499_v63, %v4500_v22 }
 0x1d6   : > { %2664 = vmatpush3.bf16.msra.mxu0 %v3716_v39  ;;  %v4504_v39 = vpack.c.bf16 %v4502_v29, %v4503_v31 }
 0x1d7   : > { %2686 = vmatpush3.bf16.msra.mxu1 %v3722_v21  ;;  %2693 = vmatprep.subr.bf16.mxu0 %v3724_v40  ;;  %v4507_v21 = vld [vmem:[#allocation60_spill] sm:$0xff]  ;;  %v4508_v40 = vld [vmem:[#allocation61_spill] sm:$0xff] }
 0x1d8   : > { %2715 = vmatprep.subr.bf16.mxu1 %v3729_v57  ;;  %v4515_v57 = vld [vmem:[#allocation68_spill] sm:$0xff] }
 0x1d9   : > { %1877 = vmatmul.mubr.bf16.vlgmr.msra.gmra.mxu0 %v4498_v9  ;;  %v2423_v36 = vpop.f32.mrf.mxu1 }
 0x1da   : > { %1918 = vmatmul.mubr.bf16.vlgmr.msra.gmra.mxu1 %v4501_v43  ;;  %2694 = vmatpush3.bf16.msra.mxu0 %v3738_v41  ;;  %v4517_v41 = vld [vmem:[#allocation70_spill] sm:$0xff] }
 0x1db   : > { %1958 = vmatprep.mubr.bf16.mxu0 %v4504_v39  ;;  %2716 = vmatpush3.bf16.msra.mxu1 %v3742_v60  ;;  %v4506_v60 = vld [vmem:[#allocation59_spill] sm:$0xff]  ;;  %v2424_v12 = vpop.f32.mrf.mxu1 }
 0x1dc   : > { %2695 = vmatprep.subr.bf16.mxu0 %v3745_v53  ;;  %2717 = vmatprep.subr.bf16.mxu1 %v3747_v25  ;;  %v4505_v25 = vld [vmem:[#allocation58_spill] sm:$0xff]  ;;  %v4514_v53 = vld [vmem:[#allocation67_spill] sm:$0xff] }
 0x1dd   : > { %1999 = vmatprep.mubr.bf16.mxu1 %v693_v52  ;;  %v2426_v54 = vpop.f32.mrf.mxu1 }
 0x1de   : > { %2696 = vmatpush3.bf16.msra.mxu0 %v3756_v47  ;;  %v4519_v47 = vld [vmem:[#allocation51_spill] sm:$0xff] }
 0x1df   : > { %2718 = vmatpush3.bf16.msra.mxu1 %v3760_v23  ;;  %2697 = vmatprep.subr.bf16.mxu0 %v3762_v10  ;;  %v4521_v10 = vld [vmem:[#allocation54_spill] sm:$0xff]  ;;  %v2427_v44 = vpop.f32.mrf.mxu1 }
 0x1e0   : > { %2719 = vmatprep.subr.bf16.mxu1 %v3766_v56  ;;  %v4522_v56 = vld [vmem:[#allocation53_spill] sm:$0xff] }
 0x1e2   : > { %2698 = vmatpush3.bf16.msra.mxu0 %v3770_v5  ;;  %v4523_v5 = vpack.c.bf16 %v4521_v10, %v4522_v56  ;;  %v2425_v56 = vadd.f32 %v2424_v12, %v2423_v36 }
 0x1e3   : > { %2720 = vmatpush3.bf16.msra.mxu1 %v3774_v58  ;;  %2699 = vmatprep.subr.bf16.mxu0 %v3776_v13  ;;  %v4509_v13 = vld [vmem:[#allocation62_spill] sm:$0xff]  ;;  %v2357_v58 = vpop.f32.mrf.mxu0 }
 0x1e4   : > { %2721 = vmatprep.subr.bf16.mxu1 %v3779_v18  ;;  %v4510_v18 = vld [vmem:[#allocation63_spill] sm:$0xff] }
 0x1e5   : > { %v2358_v33 = vpop.f32.mrf.mxu0 }
 0x1e6   : > { %2700 = vmatpush3.bf16.msra.mxu0 %v3782_v26  ;;  %v4511_v26 = vld [vmem:[#allocation64_spill] sm:$0xff] }
 0x1e7   : > { %2722 = vmatpush3.bf16.msra.mxu1 %v3786_v19  ;;  %2701 = vmatprep.subr.bf16.mxu0 %v3788_v14  ;;  %v4512_v19 = vld [vmem:[#allocation65_spill] sm:$0xff]  ;;  %v4513_v14 = vld [vmem:[#allocation66_spill] sm:$0xff]  ;;  %v2360_v35 = vpop.f32.mrf.mxu0 }
 0x1e8   : > { %2723 = vmatprep.subr.bf16.mxu1 %v4505_v25 }
 0x1e9   : > { %v2361_v16 = vpop.f32.mrf.mxu0 }
 0x1ea   : > { %2702 = vmatpush3.bf16.msra.mxu0 %v3794_v50  ;;  %v4516_v50 = vld [vmem:[#allocation69_spill] sm:$0xff] }
 0x1eb   : > { %2724 = vmatpush3.bf16.msra.mxu1 %v4506_v60  ;;  %2703 = vmatprep.subr.bf16.mxu0 %v3800_v46  ;;  %v4518_v46 = vld [vmem:[#allocation52_spill] sm:$0xff]  ;;  %v2401_v28 = vpop.f32.mrf.mxu0 }
 0x1ec   : > { %2725 = vmatprep.subr.bf16.mxu1 %v4507_v21  ;;  %v4520_v23 = vpack.c.bf16 %v4518_v46, %v4519_v47 }
 0x1ed   : > { %v2402_v11 = vpop.f32.mrf.mxu0 }
 0x1ee   : > { %2704 = vmatpush3.bf16.msra.mxu0 %v4508_v40 }
 0x1ef   : > { %2726 = vmatpush3.bf16.msra.mxu1 %v4509_v13  ;;  %2705 = vmatprep.subr.bf16.mxu0 %v4510_v18  ;;  %v2404_v3 = vpop.f32.mrf.mxu0  ;;  %v2359_v13 = vadd.f32 %v2358_v33, %v2357_v58  ;;  %v2381_v18 = vadd.f32 %v2380_v34, %v2379_v32 }
 0x1f0   : > { %2727 = vmatprep.subr.bf16.mxu1 %v4511_v26 }
 0x1f1   : > { %v2405_v45 = vpop.f32.mrf.mxu0 }
 0x1f2   : > { %2706 = vmatpush3.bf16.msra.mxu0 %v4512_v19  ;;  %v2403_v19 = vadd.f32 %v2402_v11, %v2401_v28  ;;  %v2406_v47 = vadd.f32 %v2405_v45, %v2404_v3 }
 0x1f3   : > { %2728 = vmatpush3.bf16.msra.mxu1 %v4513_v14  ;;  %2707 = vmatprep.subr.bf16.mxu0 %v4514_v53  ;;  %v1346_v53 = vadd.f32 %v2381_v18, %v2359_v13 }
 0x1f4   : > { %2729 = vmatprep.subr.bf16.mxu1 %v4515_v57  ;;  %v2362_v57 = vadd.f32 %v2361_v16, %v2360_v35 }
 0x1f5   : > { %v1387_v46 = vadd.f32 %v2403_v19, %v1346_v53 }
 0x1f6   : > { %2708 = vmatpush3.bf16.msra.mxu0 %v4516_v50  ;;  %v2384_v50 = vadd.f32 %v2383_v59, %v2382_v15 }
 0x1f7   : > { %2730 = vmatpush3.bf16.msra.mxu1 %v4517_v41 }
 0x1f8   : > { %v1349_v10 = vadd.f32 %v2384_v50, %v2362_v57 }
 0x1f9   : > { %1959 = vmatmul.mubr.bf16.vlgmr.msra.gmra.mxu0 %v4520_v23  ;;  %v2445_v7 = vpop.f32.mrf.mxu0 }
 0x1fa   : > { %2000 = vmatmul.mubr.bf16.vlgmr.msra.gmra.mxu1 %v4523_v5  ;;  %v2467_v4 = vpop.f32.mrf.mxu1 }
 0x1fb   : > { %v2446_v27 = vpop.f32.mrf.mxu0 }
 0x1fc   : > { %v2468_v30 = vpop.f32.mrf.mxu1  ;;  %v2447_v5 = vadd.f32 %v2446_v27, %v2445_v7 }
 0x1fd   : > { %v2448_v0 = vpop.f32.mrf.mxu0  ;;  %v2469_v11 = vadd.f32 %v2468_v30, %v2467_v4 }
 0x1fe   : > { %v2470_v38 = vpop.f32.mrf.mxu1 }
 0x1ff   : > { %v2449_v51 = vpop.f32.mrf.mxu0 }
 0x200   : > { %v2471_v48 = vpop.f32.mrf.mxu1  ;;  %v2450_v32 = vadd.f32 %v2449_v51, %v2448_v0 }
 0x201   : > { %v2472_v45 = vadd.f32 %v2471_v48, %v2470_v38 }
 0x219   : > { %v2489_v62 = vpop.f32.mrf.mxu0 }
 0x21a   : > { %v2511_v1 = vpop.f32.mrf.mxu1 }
 0x21b   : > { %v2490_v17 = vpop.f32.mrf.mxu0 }
 0x21c   : > { %v2512_v55 = vpop.f32.mrf.mxu1  ;;  %v2491_v35 = vadd.f32 %v2490_v17, %v2489_v62 }
 0x21d   : > { %v2492_v8 = vpop.f32.mrf.mxu0  ;;  %v2513_v27 = vadd.f32 %v2512_v55, %v2511_v1 }
 0x21e   : > { %v4126_v49 = vpop.f32.mrf.mxu1 }
 0x21f   : > { %v2493_v20 = vpop.f32.mrf.mxu0 }
 0x220   : > { %v2515_v24 = vpop.f32.mrf.mxu1  ;;  %v2494_v36 = vadd.f32 %v2493_v20, %v2492_v8 }
 0x221   : > { %v2516_v4 = vadd.f32 %v2515_v24, %v4126_v49 }
 0x239   : > { %v2533_v42 = vpop.f32.mrf.mxu0 }
 0x23a   : > { %v4128_v37 = vpop.f32.mrf.mxu1 }
 0x23b   : > { %v2534_v6 = vpop.f32.mrf.mxu0 }
 0x23c   : > { %v4130_v61 = vpop.f32.mrf.mxu1  ;;  %v2535_v18 = vadd.f32 %v2534_v6, %v2533_v42 }
 0x23d   : > { %v2536_v2 = vpop.f32.mrf.mxu0  ;;  %v2557_v1 = vadd.f32 %v4130_v61, %v4128_v37 }
 0x23e   : > { %v4132_v9 = vpop.f32.mrf.mxu1 }
 0x23f   : > { %v2537_v52 = vpop.f32.mrf.mxu0 }
 0x240   : > { %v4136_v22 = vpop.f32.mrf.mxu1  ;;  %v2538_v62 = vadd.f32 %v2537_v52, %v2536_v2 }
 0x259   : > { %v4134_v63 = vpop.f32.mrf.mxu0 }
 0x25a   : > { %v4138_v43 = vpop.f32.mrf.mxu1 }
 0x25b   : > { %4524 = vst [vmem:[#allocation15_spill] sm:$0xff] %v4138_v43  ;;  %v2578_v29 = vpop.f32.mrf.mxu0  ;;  %v1390_v43 = vadd.f32 %v2406_v47, %v1349_v10 }
 0x25c   : > { %v4140_v31 = vpop.f32.mrf.mxu1  ;;  %v2579_v55 = vadd.f32 %v2578_v29, %v4134_v63 }
 0x25d   : > { %4525 = vst [vmem:[#allocation14_spill] sm:$0xff] %v4140_v31  ;;  %v4142_v39 = vpop.f32.mrf.mxu0  ;;  %v1428_v31 = vadd.f32 %v2425_v56, %v1387_v46 }
 0x25e   : > { %v4144_v25 = vpop.f32.mrf.mxu1 }
 0x25f   : > { %4526 = vst [vmem:[#allocation16_spill] sm:$0xff] %v4144_v25  ;;  %v4146_v60 = vpop.f32.mrf.mxu0  ;;  %v1469_v58 = vadd.f32 %v2447_v5, %v1428_v31 }
 0x260   : > { %4527 = vst [vmem:[#allocation17_spill] sm:$0xff] %v4146_v60  ;;  %v4148_v40 = vpop.f32.mrf.mxu1 }
 0x261   : > { %4528 = vst [vmem:[#allocation18_spill] sm:$0xff] %v4148_v40  ;;  %v2428_v40 = vadd.f32 %v2427_v44, %v2426_v54  ;;  %v1510_v16 = vadd.f32 %v2469_v11, %v1469_v58 }
 0x262   : > { %v4530_v47 = vld [vmem:[#allocation15_spill] sm:$0xff] }
 0x263   : > { %v1431_v28 = vadd.f32 %v2428_v40, %v1390_v43  ;;  %v1551_v13 = vadd.f32 %v2491_v35, %v1510_v16  ;;  %v2010_v40 = vlaneseq }
 0x265   : > { %v1472_v59 = vadd.f32 %v2450_v32, %v1431_v28  ;;  %v1592_v0 = vadd.f32 %v2513_v27, %v1551_v13  ;;  %v2011_v49 = vand.u32 127, %v2010_v40 }
 0x266   : > { %v4534_v16 = vld [vmem:[#allocation16_spill] sm:$0xff] }
 0x267   : > { %v1513_v7 = vadd.f32 %v2472_v45, %v1472_v59  ;;  %v1633_v30 = vadd.f32 %v2535_v18, %v1592_v0  ;;  %v4529_v50 = vld [vmem:[#allocation17_spill] sm:$0xff]  ;;  %vm2012_vm3 = vcmp.ge.s32.totalorder %v2011_v49, 41  ;;  %vm2013_vm4 = vcmp.lt.s32.totalorder %v2011_v49, 46 }
 0x268   : > { %v2582_v37 = vadd.f32 %v4529_v50, %v4142_v39  ;;  %vm4160_vm5 = vmand %vm2012_vm3, %vm2013_vm4  ;;  %v4535_v59 = vld [vmem:[#allocation18_spill] sm:$0xff]  ;;  %vm2021_vm6 = vcmp.eq.s32.totalorder %v2011_v49, 0 }
 0x269   : > { %v1554_v51 = vadd.f32 %v2494_v36, %v1513_v7 }
 0x26b   : > { %v1595_v20 = vadd.f32 %v2516_v4, %v1554_v51 }
 0x279   : > { %v2621_v21 = vpop.f32.mrf.mxu0 }
 0x27a   : > { %v2643_v26 = vpop.f32.mrf.mxu1 }
 0x27b   : > { %v2622_v14 = vpop.f32.mrf.mxu0 }
 0x27c   : > { %v2644_v41 = vpop.f32.mrf.mxu1  ;;  %v2623_v54 = vadd.f32 %v2622_v14, %v2621_v21  ;;  %v1636_v14 = vadd.f32 %v2538_v62, %v1595_v20 }
 0x27d   : > { %v2624_v23 = vpop.f32.mrf.mxu0  ;;  %v2645_v44 = vadd.f32 %v2644_v41, %v2643_v26  ;;  %v1674_v26 = vadd.f32 %v2557_v1, %v1633_v30 }
 0x27e   : > { %v2646_v25 = vpop.f32.mrf.mxu1 }
 0x27f   : > { %v2625_v60 = vpop.f32.mrf.mxu0  ;;  %v1838_v38 = vadd.f32 %v2645_v44, %v2623_v54  ;;  %v2333_v54 = vadd.s32 4294967255, %v2011_v49 }
 0x280   : > { %v2647_v34 = vpop.f32.mrf.mxu1  ;;  %v2626_v48 = vadd.f32 %v2625_v60, %v2624_v23  ;;  %v2560_v60 = vadd.f32 %v4136_v22, %v4132_v9  ;;  %v4531_v23 = vld [vmem:[#allocation14_spill] sm:$0xff] }
 0x281   : > { %v2648_v8 = vadd.f32 %v2647_v34, %v2646_v25  ;;  %v1715_v25 = vadd.f32 %v2579_v55, %v1674_v26  ;;  %v2601_v10 = vadd.f32 %v4531_v23, %v4530_v47 }
 0x282   : > { %v1677_v46 = vadd.f32 %v2560_v60, %v1636_v14 }
 0x283   : > { %v1841_v24 = vadd.f32 %v2648_v8, %v2626_v48  ;;  %v1756_v9 = vadd.f32 %v2601_v10, %v1715_v25 }
 0x284   : > { %v1718_v34 = vadd.f32 %v2582_v37, %v1677_v46 }
 0x299   : > { %v2665_v33 = vpop.f32.mrf.mxu0 }
 0x29a   : > { %v2687_v15 = vpop.f32.mrf.mxu1 }
 0x29b   : > { %v2666_v3 = vpop.f32.mrf.mxu0 }
 0x29c   : > { %v2688_v12 = vpop.f32.mrf.mxu1  ;;  %v2667_v31 = vadd.f32 %v2666_v3, %v2665_v33  ;;  %v2604_v3 = vadd.f32 %v4535_v59, %v4534_v16 }
 0x29d   : > { %v2668_v19 = vpop.f32.mrf.mxu0  ;;  %v2689_v2 = vadd.f32 %v2688_v12, %v2687_v15 }
 0x29e   : > { %v2690_v43 = vpop.f32.mrf.mxu1  ;;  %v1879_v42 = vadd.f32 %v2667_v31, %v1838_v38  ;;  %v1759_v12 = vadd.f32 %v2604_v3, %v1718_v34 }
 0x29f   : > { %v2669_v17 = vpop.f32.mrf.mxu0 }
 0x2a0   : > { %v2670_v6 = vadd.f32 %v2669_v17, %v2668_v19  ;;  %v2691_v21 = vpop.f32.mrf.mxu1  ;;  %v1920_v61 = vadd.f32 %v2689_v2, %v1879_v42 }
 0x2a1   : > { %v2692_v5 = vadd.f32 %v2691_v21, %v2690_v43 }
 0x2a2   : > { %v1882_v63 = vadd.f32 %v2670_v6, %v1841_v24 }
 0x2a4   : > { %v1923_v28 = vadd.f32 %v2692_v5, %v1882_v63 }
 0x2b9   : > { %v2709_v53 = vpop.f32.mrf.mxu0 }
 0x2ba   : > { %v2731_v52 = vpop.f32.mrf.mxu1 }
 0x2bb   : > { %v2710_v57 = vpop.f32.mrf.mxu0 }
 0x2bc   : > { %v2711_v29 = vadd.f32 %v2710_v57, %v2709_v53  ;;  %v2732_v41 = vpop.f32.mrf.mxu1 }
 0x2bd   : > { %v2712_v56 = vpop.f32.mrf.mxu0  ;;  %v2733_v32 = vadd.f32 %v2732_v41, %v2731_v52 }
 0x2be   : > { %v1961_v58 = vadd.f32 %v2711_v29, %v1920_v61  ;;  %v2734_v33 = vpop.f32.mrf.mxu1 }
 0x2bf   : > { %v2713_v22 = vpop.f32.mrf.mxu0 }
 0x2c0   : > { %v2002_v39 = vadd.f32 %v2733_v32, %v1961_v58  ;;  %v2714_v11 = vadd.f32 %v2713_v22, %v2712_v56  ;;  %v2735_v35 = vpop.f32.mrf.mxu1 }
 0x2c1   : > { %v2736_v13 = vadd.f32 %v2735_v35, %v2734_v33 }
 0x2c2   : > { %v1964_v45 = vadd.f32 %v2714_v11, %v1923_v28  ;;  %v2008_v36 = vadd.f32 %v2002_v39, %v1756_v9 }
 0x2c4   : > { %v2005_v7 = vadd.f32 %v2736_v13, %v1964_v45  ;;  %v2015_v27 = vsel %vm4160_vm5, %v2008_v36, -inf }
 0x2c5   : > { %2017 = vmax.xlane.f32.xlu0 %v2015_v27 }
 0x2c6   : > { %v2009_v18 = vadd.f32 %v2005_v7, %v1759_v12 }
 0x2c8   : > { %v2016_v19 = vsel %vm4160_vm5, %v2009_v18, -inf }
 0x2c9   : > { %2019 = vmax.xlane.f32.xlu1 %v2016_v19 }
 0x34e   : > { %v2018_v44 = vpop.xlane.xlu0 %2017 }
 0x34f   : > { %v2022_v0 = vsel %vm2021_vm6, %v2018_v44, %v2008_v36  ;;  %vm2026_vm7 = vcmp.eq.f32.partialorder %v2015_v27, %v2018_v44 }
 0x350   : > { %2024 = vst [vmem:[%s4172_s29] sm:$0xff] %v2022_v0  ;;  %vm2028_vm8 = vmand %vm4160_vm5, %vm2026_vm7 }
 0x351   : > { %v2031_v51 = vsel %vm2028_vm8, %v2333_v54, 5 }
 0x352   : > { %v2020_v31 = vpop.xlane.xlu1 %2019  ;;  %v2034_v43 = vshra.s32 %v2031_v51, 16  ;;  %v2033_v38 = vand.u32 65535, %v2031_v51 }
 0x353   : > { %v2023_v4 = vsel %vm2021_vm6, %v2020_v31, %v2009_v18  ;;  %vm2027_vm9 = vcmp.eq.f32.partialorder %v2016_v19, %v2020_v31 }
 0x354   : > { %2025 = vst [vmem:[%s4172_s29 + $0x8] sm:$0xff] %v2023_v4  ;;  %vm2029_vm10 = vmand %vm4160_vm5, %vm2027_vm9  ;;  %v2036_v30 = vcvt.s32.f32 %v2034_v43  ;;  %v2035_v8 = vcvt.s32.f32 %v2033_v38 }
 0x355   : > { %v2032_v62 = vsel %vm2029_vm10, %v2333_v54, 5 }
 0x356   : > { %2037 = vmin.xlane.f32.xlu0 %v2036_v30  ;;  %v2048_v17 = vshra.s32 %v2032_v62, 16  ;;  %v2047_v20 = vand.u32 65535, %v2032_v62 }
 0x358   : > { %v2050_v40 = vcvt.s32.f32 %v2048_v17  ;;  %v2049_v42 = vcvt.s32.f32 %v2047_v20 }
 0x35a   : > { %2051 = vmin.xlane.f32.xlu0 %v2050_v40 }
 0x3df   : > { %v2038_v48 = vpop.xlane.xlu0 %2037 }
 0x3e0   : > { %vm2039_vm11 = vcmp.eq.f32.partialorder %v2036_v30, %v2038_v48 }
 0x3e1   : > { %v2040_v1 = vsel %vm2039_vm11, %v2035_v8, inf }
 0x3e2   : > { %2041 = vmin.xlane.f32.xlu1 %v2040_v1 }
 0x3e3   : > { %v2052_v55 = vpop.xlane.xlu0 %2051 }
 0x3e4   : > { %vm2053_vm12 = vcmp.eq.f32.partialorder %v2050_v40, %v2052_v55 }
 0x3e5   : > { %v2054_v6 = vsel %vm2053_vm12, %v2049_v42, inf }
 0x3e6   : > { %2055 = vmin.xlane.f32.xlu0 %v2054_v6 }
 0x3e7   : > { %3038 = shalt.err (!%p3035_p10)
}
 0x3e8   : > { %s3039_s0 = scalar_lea.hbm %s4187_s8, 256  ;;  %s3043_s14 = scalar_lea.hbm %s4237_s3, 512 }
 0x3e9   : > { %p3040_p1 = scmp.ne.s32.totalorder %s4187_s8, %s3039_s0  ;;  %p3044_p7 = scmp.lt.s32.totalorder %s4187_s8, %s4237_s3 }
 0x3ea   : > { %p3045_p8 = scmp.lt.s32.totalorder %s3043_s14, %s3039_s0 }
 0x3eb   : > { %p3041_p4 = pnand %p3040_p1, %p4536_p12 }
 0x3ec   : > { %p3046_p11 = por %p3045_p8, %p3044_p7 }
 0x3ed   : > { %p3042_p3 = pneg %p3041_p4 }
 0x3ef   : > { %p3047_p6 = pnand %p3046_p11, %p3042_p3 }
 0x3f1   : > { %3050 = shalt.err (!%p3047_p6)
}
 0x3f2   : > { %s3112_s21 = smov 128   ;;  %s3113_s29 = smov 8   ;;  %v2044_v21 = vcvt.f32.s32 %v2038_v48  ;;  %v2058_v53 = vcvt.f32.s32 %v2052_v55  ;;  %vm2065_vm13 = vcmask 7168  }
 0x3f3   : > { %2748 = dma.vmem_to_hbm [thread:$0]  (%p4536_p12), %s4181_s30, 256, %s4187_s8, %s2069_s2, %s3112_s21, %s3112_s21, %s3113_s29  }
 0x3f4   : > { %s2235_s5 = sshll.u32 %s3160_s19, 1  ;;  %v2045_v14 = vshll.u32 %v2044_v21, 16  ;;  %v2059_v52 = vshll.u32 %v2058_v53, 16 }
 0x3f5   : > { %p283_p2 = scmp.lt.s32.totalorder %s2235_s5, 3 }
 0x3f7   : > { %s4544_s5 = smov (!%p283_p2, %s2235_s5), 3 }
 0x3f8   : > { %s2236_s6 = sshll.u32 %s4544_s5, 3 }
 0x3f9   : > { %s286_s20 = scalar_lea.vmem %s4238_s4, %s2236_s6 }
 0x46b   : > { %v2042_v26 = vpop.xlane.xlu1 %2041 }
 0x46c   : > { %v2043_v49 = vcvt.f32.s32 %v2042_v26 }
 0x46e   : > { %v2046_v24 = vadd.s32 %v2045_v14, %v2043_v49 }
 0x46f   : > { %v2056_v2 = vpop.xlane.xlu0 %2055 }
 0x470   : > { %vm2061_vm14 = vcmp.lt.s32.totalorder %v2046_v24, 4  ;;  %v2057_v60 = vcvt.f32.s32 %v2056_v2 }
 0x471   : > { %v2062_v25 = vsel %vm2061_vm14, %v2046_v24, 4 }
 0x472   : > { %2066 = vst.msk [vmem:[%s286_s20] sm:$0xff] %vm2065_vm13, %v2062_v25  ;;  %v2060_v57 = vadd.s32 %v2059_v52, %v2057_v60 }
 0x474   : > { %vm2063_vm15 = vcmp.lt.s32.totalorder %v2060_v57, 4 }
 0x475   : > { %v2064_v50 = vsel %vm2063_vm15, %v2060_v57, 4 }
 0x476   : > { %2067 = vst.msk [vmem:[%s286_s20 + $0x8] sm:$0xff] %vm2065_vm13, %v2064_v50 }
 0x477 PF: > { %s2106_s19 = sand.u32 1, %s3085_s15   ;;  %p4537_p12 = scmp.ne.s32.totalorder %s4340_s22, 0 }
 0x478   : > { %p4538_p13 = scmp.ge.s32.totalorder %s3097_s18, 2  ;;  %s2107_s10 = scalar_lea.sflag [#allocation4], %s2106_s19 }
 0x47a   : > { %p2762_p0 = pnand %p4538_p13, %p4537_p12 }
 0x47c   : > { %p2763_p5 = pneg %p2762_p0 }
 0x47e   : > { %3080 = dma.done.wait (%p2763_p5), %s2107_s10, 256  }
 0x47f   : > { %3082 = vsyncadd (%p2763_p5), %s2107_s10, 4294967040  ;;  %p21_p9 = scmp.ge.s32.totalorder %s3193_s27, 4   ;;  %s4539_s15 = smov %s3089_s16 }
 0x480   : > { %s4540_s16 = smov %s3093_s17  ;;  %s4541_s17 = smov %s3210_s9 }
 0x481   : > { %s4542_s18 = smov %s3193_s27  ;;  %23 = sbr.rel (!%p21_p9) target bundleno = 10 (0xa), region = 106 }
 0x486   :  { %2120 = vsyncpa [#allocation3], 1 }
 0x487   :  { %2122 = vsyncpa [#allocation3 + $0x1], 1 }
 0x488   :  { %2123 = vsyncpa [#allocation6], 1 }
 0x489   :  { %2125 = vsyncpa [#allocation6 + $0x1], 1 }
 0x48a   :  { %2126 = vsyncpa [#allocation4], 1 }
 0x48b   :  { %2128 = vsyncpa [#allocation4 + $0x1], 1 }

</bundles_post_ra>
